<compile_context>
chip_gen: v5e
topology: v5e:2x2
jax: 0.10.0
libtpu: 0.0.40
codegen_flags: <defaults>
</compile_context>

<pallas_src>
import jax
import jax.numpy as jnp
from jax.experimental import pallas as pl
from jax.experimental.pallas import tpu as pltpu


def _round_up(v, m):
    return -(-v // m) * m


def _choose_batch_tile(B, batch_tile):
    """Pick graphs-per-grid-step: divisor of B when possible, grid length >= 2."""
    cap = max(1, min(batch_tile, B))
    if B >= 2:
        cap = min(cap, (B + 1) // 2)     # keep >= 2 grid steps for v7x megacore
    div = max(d for d in range(1, cap + 1) if B % d == 0)
    # Prefer the zero-waste divisor unless it is much smaller than the cap.
    return div if div * 2 >= cap else cap


def _make_kernel(depth, Bt, N, nhid_pad, rows_t, mxu_dtype):
    """Kernel body for one tile of Bt graphs (row-flattened to rows_t = Bt*N)."""

    def kernel(*refs):
        x_ref, adjn_ref, rep_ref, flags_ref = refs[:4]
        p = 4
        layer_refs = refs[p:p + 3 * depth]
        p += 3 * depth
        (w1x_ref, w1h_ref, b1_ref, w2_ref, b2_ref, w3_ref, b3_ref) = refs[p:p + 7]
        p += 7
        out_ref = refs[p]
        hs_ref = refs[p + 1]                       # (rows_t, depth*nhid_pad)

        x = x_ref[...]                             # (rows_t, nfeat)   mxu dtype
        rep = rep_ref[...]                         # (rows_t, nrep)    mxu dtype
        adjn = adjn_ref[...]                       # (Bt, N, N)        mxu dtype

        h = x
        for l in range(depth):
            Wh = layer_refs[3 * l][...]            # (h_in, nhid_pad)  mxu dtype
            Wr = layer_refs[3 * l + 1][...]        # (nrep, nhid_pad)  mxu dtype
            b = layer_refs[3 * l + 2][...]         # (1, nhid_pad)     f32

            # concat([h, rep]) @ W  ==  h @ Wh + rep @ Wr  (no in-kernel concat)
            lin = (jnp.dot(h, Wh, preferred_element_type=jnp.float32) +
                   jnp.dot(rep, Wr, preferred_element_type=jnp.float32))

            # Batched per-graph propagation: conv[g] = adj_norm[g] @ lin[g].
            # Free-view reshape (N is a multiple of 16); results stay in vregs.
            lin3 = lin.astype(mxu_dtype).reshape(Bt, N, nhid_pad)
            conv = jax.lax.dot_general(
                adjn, lin3,
                dimension_numbers=(((2,), (1,)), ((0,), (0,))),
                preferred_element_type=jnp.float32,
            ).reshape(rows_t, nhid_pad)

            hf = jnp.tanh(conv + b)                # f32 activation (v5e-safe)
            h = hf.astype(mxu_dtype)
            # 128-lane-aligned full-lane store into the xs staging slab.
            hs_ref[:, l * nhid_pad:(l + 1) * nhid_pad] = h

        # Final MLP: Linear -> SiLU -> Linear -> SiLU -> Linear.
        # concat([x, h1..hD]) @ W1 == x @ W1x + hs @ W1h (single wide-K matmul).
        z = (jnp.dot(x, w1x_ref[...], preferred_element_type=jnp.float32) +
             jnp.dot(hs_ref[...], w1h_ref[...], preferred_element_type=jnp.float32) +
             b1_ref[...])
        z = z * jax.nn.sigmoid(z)                  # SiLU in f32
        z = jnp.dot(z.astype(mxu_dtype), w2_ref[...],
                    preferred_element_type=jnp.float32) + b2_ref[...]
        z = z * jax.nn.sigmoid(z)
        z = jnp.dot(z.astype(mxu_dtype), w3_ref[...],
                    preferred_element_type=jnp.float32) + b3_ref[...]

        # mask_x: multiply by flags; lane-dense (rows_t, nout_pad) store.
        out_ref[...] = z * flags_ref[...]

    return kernel


def node_score_network_dense_03(x, adj, node_3D_repr, flags, params, *,
                                depth, nout, batch_tile=32,
                                mxu_dtype=jnp.bfloat16):
    assert depth >= 1
    f32 = jnp.float32
    B, N, nfeat = x.shape
    nrep = node_3D_repr.shape[-1]
    nhid = params["layers"][0][0].shape[1]
    fdim = nfeat + depth * nhid
    hid2 = 2 * fdim

    x = x.astype(f32)
    adj = adj.astype(f32)
    node_3D_repr = node_3D_repr.astype(f32)
    if flags is None:
        flags = jnp.ones((B, N), dtype=f32)
    flags = flags.astype(f32)

    # ---- DenseGCNConv normalization hoisted to the XLA wrapper ----
    eye = jnp.eye(N, dtype=f32)
    adj_sl = jnp.where(eye[None] > 0, 1.0, adj)
    deg = adj_sl.sum(-1)
    dinv = 1.0 / jnp.sqrt(jnp.maximum(deg, 1.0))
    adj_norm = dinv[:, :, None] * adj_sl * dinv[:, None, :]

    # ---- pad N to a multiple of 16 (bf16 sublane packing; keeps the in-kernel
    #      (rows_t, C) <-> (Bt, N, C) reshape a pure view).  Exact: padded nodes
    #      have zero adjacency rows/cols and zero flags. ----
    N_pad = _round_up(N, 16)
    if N_pad != N:
        x = jnp.pad(x, ((0, 0), (0, N_pad - N), (0, 0)))
        node_3D_repr = jnp.pad(node_3D_repr, ((0, 0), (0, N_pad - N), (0, 0)))
        adj_norm = jnp.pad(adj_norm, ((0, 0), (0, N_pad - N), (0, N_pad - N)))
        flags = jnp.pad(flags, ((0, 0), (0, N_pad - N)))

    # ---- batch tiling ----
    Bt = _choose_batch_tile(B, batch_tile)
    B_pad = _round_up(B, Bt)
    if B_pad != B:
        x = jnp.pad(x, ((0, B_pad - B), (0, 0), (0, 0)))
        node_3D_repr = jnp.pad(node_3D_repr, ((0, B_pad - B), (0, 0), (0, 0)))
        adj_norm = jnp.pad(adj_norm, ((0, B_pad - B), (0, 0), (0, 0)))
        flags = jnp.pad(flags, ((0, B_pad - B), (0, 0)))

    rows_t = Bt * N_pad
    x2d = x.reshape(B_pad * N_pad, nfeat).astype(mxu_dtype)
    rep2d = node_3D_repr.reshape(B_pad * N_pad, nrep).astype(mxu_dtype)
    flags2d = flags.reshape(B_pad * N_pad, 1)                    # f32
    adj_norm = adj_norm.astype(mxu_dtype)

    # ---- 128-lane padding of every intermediate width (exact) ----
    # Note: on v5e the 128-wide nout pad inflates output HBM writeback; keep it
    # here since v6e/v7x bandwidth makes the unmasked-store win dominate.
    nhid_pad = _round_up(nhid, 128)
    hid2_pad = _round_up(hid2, 128)
    nout_pad = _round_up(nout, 128)

    layer_inputs = []
    for l, (W, b) in enumerate(params["layers"]):
        W = W.astype(f32)
        h_in = nfeat if l == 0 else nhid
        h_in_pad = nfeat if l == 0 else nhid_pad
        Wh = jnp.zeros((h_in_pad, nhid_pad), f32).at[:h_in, :nhid].set(W[:h_in])
        Wr = jnp.zeros((nrep, nhid_pad), f32).at[:, :nhid].set(W[h_in:])
        bb = jnp.zeros((1, nhid_pad), f32).at[:, :nhid].set(
            b.astype(f32).reshape(1, nhid))
        layer_inputs += [Wh.astype(mxu_dtype), Wr.astype(mxu_dtype), bb]

    fin = params["final"]
    W1 = fin["W1"].astype(f32)                                   # (fdim, hid2)
    W1x = jnp.zeros((nfeat, hid2_pad), f32).at[:, :hid2].set(W1[:nfeat])
    W1h = jnp.zeros((depth * nhid_pad, hid2_pad), f32)
    for l in range(depth):
        blk = W1[nfeat + l * nhid: nfeat + (l + 1) * nhid]
        W1h = W1h.at[l * nhid_pad: l * nhid_pad + nhid, :hid2].set(blk)
    b1 = jnp.zeros((1, hid2_pad), f32).at[:, :hid2].set(
        fin["b1"].astype(f32).reshape(1, hid2))
    W2 = jnp.zeros((hid2_pad, hid2_pad), f32).at[:hid2, :hid2].set(
        fin["W2"].astype(f32))
    b2 = jnp.zeros((1, hid2_pad), f32).at[:, :hid2].set(
        fin["b2"].astype(f32).reshape(1, hid2))
    W3 = jnp.zeros((hid2_pad, nout_pad), f32).at[:hid2, :nout].set(
        fin["W3"].astype(f32))
    b3 = jnp.zeros((1, nout_pad), f32).at[:, :nout].set(
        fin["b3"].astype(f32).reshape(1, nout))

    param_inputs = layer_inputs + [
        W1x.astype(mxu_dtype), W1h.astype(mxu_dtype), b1,
        W2.astype(mxu_dtype), b2, W3.astype(mxu_dtype), b3]

    inputs = [x2d, adj_norm, rep2d, flags2d] + param_inputs

    def const2d(arr):
        return pl.BlockSpec(arr.shape, lambda g: (0, 0))

    in_specs = [
        pl.BlockSpec((rows_t, nfeat), lambda g: (g, 0)),
        pl.BlockSpec((Bt, N_pad, N_pad), lambda g: (g, 0, 0)),
        pl.BlockSpec((rows_t, nrep), lambda g: (g, 0)),
        pl.BlockSpec((rows_t, 1), lambda g: (g, 0)),
    ] + [const2d(p) for p in param_inputs]

    # ---- explicit VMEM budget (v5e scoped default 16 MiB; v7x 64 MiB phys) ----
    itm = jnp.dtype(mxu_dtype).itemsize
    stream_bytes = (rows_t * nfeat * itm + Bt * N_pad * N_pad * itm +
                    rows_t * nrep * itm + rows_t * 4 + rows_t * nout_pad * 4)
    param_bytes = sum(int(p.size) * p.dtype.itemsize for p in param_inputs)
    scratch_bytes = rows_t * depth * nhid_pad * itm
    interm_bytes = rows_t * (2 * nhid_pad + 2 * hid2_pad) * 4
    est = 2 * stream_bytes + 2 * param_bytes + scratch_bytes + interm_bytes
    vmem_limit = int(min(max(2 * est, 32 << 20), 56 << 20))

    out2d = pl.pallas_call(
        _make_kernel(depth, Bt, N_pad, nhid_pad, rows_t, mxu_dtype),
        out_shape=jax.ShapeDtypeStruct((B_pad * N_pad, nout_pad), f32),
        grid=(B_pad // Bt,),
        in_specs=in_specs,
        out_specs=pl.BlockSpec((rows_t, nout_pad), lambda g: (g, 0)),
        scratch_shapes=[pltpu.VMEM((rows_t, depth * nhid_pad), mxu_dtype)],
        compiler_params=pltpu.CompilerParams(
            dimension_semantics=("parallel",),
            vmem_limit_bytes=vmem_limit),
    )(*inputs)

    # Wrapper-side layout plumbing: back to (B, N, nout).
    return out2d.reshape(B_pad, N_pad, nout_pad)[:B, :N, :nout]


def init_params(key, nfeat, depth, nhid, nout):
    """Deterministic synthetic parameter init (matches the module's shapes)."""
    fdim = nfeat + depth * nhid
    keys = list(jax.random.split(key, 2 * depth + 6))

    def lin(k, din, dout):
        scale = 1.0 / jnp.sqrt(jnp.float32(din))
        kw, kb = jax.random.split(k)
        W = jax.random.uniform(kw, (din, dout), jnp.float32, -scale, scale)
        b = jax.random.uniform(kb, (1, dout), jnp.float32, -scale, scale)
        return W, b

    layers = []
    for l in range(depth):
        din = (nfeat + nfeat // 2) if l == 0 else (nhid + nfeat // 2)
        layers.append(lin(keys[2 * l], din, nhid))

    W1, b1 = lin(keys[2 * depth + 0], fdim, 2 * fdim)
    W2, b2 = lin(keys[2 * depth + 1], 2 * fdim, 2 * fdim)
    W3, b3 = lin(keys[2 * depth + 2], 2 * fdim, nout)
    final = dict(W1=W1, b1=b1, W2=W2, b2=b2, W3=W3, b3=b3)
    return {"layers": layers, "final": final}


def reference_forward(x, adj, node_3D_repr, flags, params, depth):
    """Pure-JAX reference (mirrors the PyTorch forward) for sanity checking."""
    B, N, _ = adj.shape
    if flags is None:
        flags = jnp.ones((B, N), dtype=jnp.float32)
    eye = jnp.eye(N, dtype=jnp.float32)
    adj_sl = jnp.where(eye[None] > 0, 1.0, adj)
    deg = adj_sl.sum(-1)
    dinv = 1.0 / jnp.sqrt(jnp.maximum(deg, 1.0))
    adj_norm = dinv[:, :, None] * adj_sl * dinv[:, None, :]

    x_list = [x]
    h = x
    for l in range(depth):
        W, b = params["layers"][l]
        hin = jnp.concatenate([h, node_3D_repr], axis=-1)
        conv = jnp.einsum("bij,bjk->bik", adj_norm, hin @ W) + b
        h = jnp.tanh(conv)
        x_list.append(h)
    xs = jnp.concatenate(x_list, axis=-1)
    f = params["final"]
    z = jax.nn.silu(xs @ f["W1"] + f["b1"])
    z = jax.nn.silu(z @ f["W2"] + f["b2"])
    z = z @ f["W3"] + f["b3"]
    return z * flags[:, :, None]


if __name__ == "__main__":
    # Small, module-consistent shapes (exercises two grid tiles of Bt=3 graphs).
    B, N = 6, 16
    nfeat, depth, nhid, nout = 8, 2, 16, 4

    key = jax.random.PRNGKey(0)
    k_x, k_a, k_r, k_p = jax.random.split(key, 4)

    x = jax.random.normal(k_x, (B, N, nfeat), dtype=jnp.float32)
    a = (jax.random.uniform(k_a, (B, N, N)) < 0.3).astype(jnp.float32)
    adj = jnp.maximum(a, jnp.swapaxes(a, 1, 2))          # symmetric 0/1 adjacency
    node_3D_repr = jax.random.normal(k_r, (B, N, nfeat // 2), dtype=jnp.float32)
    flags = jnp.ones((B, N), dtype=jnp.float32)
    flags = flags.at[1, 12:].set(0.0)                    # mask out some nodes
    flags = flags.at[4, 5:].set(0.0)

    params = init_params(k_p, nfeat, depth, nhid, nout)

    ref = jax.block_until_ready(
        reference_forward(x, adj, node_3D_repr, flags, params, depth))

    # f32-MXU path: strict structural/numerical check against the reference.
    out_f32 = jax.block_until_ready(node_score_network_dense_03(
        x, adj, node_3D_repr, flags, params, depth=depth, nout=nout,
        batch_tile=32, mxu_dtype=jnp.float32))
    assert out_f32.shape == (B, N, nout), out_f32.shape
    err32 = float(jnp.max(jnp.abs(out_f32 - ref)))
    assert jnp.allclose(out_f32, ref, atol=1e-3, rtol=1e-3), err32

    # bf16-MXU path (default, f32 accumulation): looser tolerance.
    out_bf16 = jax.block_until_ready(node_score_network_dense_03(
        x, adj, node_3D_repr, flags, params, depth=depth, nout=nout,
        batch_tile=32, mxu_dtype=jnp.bfloat16))
    assert out_bf16.shape == (B, N, nout), out_bf16.shape
    err16 = float(jnp.max(jnp.abs(out_bf16 - ref)))
    assert jnp.allclose(out_bf16, ref, atol=8e-2, rtol=8e-2), err16

    print("KERNEL_OK")
</pallas_src>

<mosaic_0001>
module attributes {stable_mosaic.version = 11 : i64} {
  func.func @kernel(%arg0: i32, %arg1: memref<48x8xf32, #tpu.memory_space<vmem>>, %arg2: memref<3x16x16xf32, #tpu.memory_space<vmem>>, %arg3: memref<48x4xf32, #tpu.memory_space<vmem>>, %arg4: memref<48x1xf32, #tpu.memory_space<vmem>>, %arg5: memref<8x128xf32, #tpu.memory_space<vmem>>, %arg6: memref<4x128xf32, #tpu.memory_space<vmem>>, %arg7: memref<1x128xf32, #tpu.memory_space<vmem>>, %arg8: memref<128x128xf32, #tpu.memory_space<vmem>>, %arg9: memref<4x128xf32, #tpu.memory_space<vmem>>, %arg10: memref<1x128xf32, #tpu.memory_space<vmem>>, %arg11: memref<8x128xf32, #tpu.memory_space<vmem>>, %arg12: memref<256x128xf32, #tpu.memory_space<vmem>>, %arg13: memref<1x128xf32, #tpu.memory_space<vmem>>, %arg14: memref<128x128xf32, #tpu.memory_space<vmem>>, %arg15: memref<1x128xf32, #tpu.memory_space<vmem>>, %arg16: memref<128x128xf32, #tpu.memory_space<vmem>>, %arg17: memref<1x128xf32, #tpu.memory_space<vmem>>, %arg18: memref<48x128xf32, #tpu.memory_space<vmem>>, %arg19: memref<48x256xf32, #tpu.memory_space<vmem>>) attributes {dimension_semantics = [#tpu.dimension_semantics<parallel>], iteration_bounds = array<i64: 2>, scalar_prefetch = 0 : i64, scratch_operands = 1 : i64, tpu.core_type = #tpu.core_type<tc>, window_params = [{transform_indices = @transform_0, window_bounds = array<i64: 48, 8>}, {transform_indices = @transform_1, window_bounds = array<i64: 3, 16, 16>}, {transform_indices = @transform_2, window_bounds = array<i64: 48, 4>}, {transform_indices = @transform_3, window_bounds = array<i64: 48, 1>}, {pipeline_mode = #tpu.pipeline_mode<synchronous>, transform_indices = @transform_4, window_bounds = array<i64: 8, 128>}, {pipeline_mode = #tpu.pipeline_mode<synchronous>, transform_indices = @transform_5, window_bounds = array<i64: 4, 128>}, {pipeline_mode = #tpu.pipeline_mode<synchronous>, transform_indices = @transform_6, window_bounds = array<i64: 1, 128>}, {pipeline_mode = #tpu.pipeline_mode<synchronous>, transform_indices = @transform_7, window_bounds = array<i64: 128, 128>}, {pipeline_mode = #tpu.pipeline_mode<synchronous>, transform_indices = @transform_8, window_bounds = array<i64: 4, 128>}, {pipeline_mode = #tpu.pipeline_mode<synchronous>, transform_indices = @transform_9, window_bounds = array<i64: 1, 128>}, {pipeline_mode = #tpu.pipeline_mode<synchronous>, transform_indices = @transform_10, window_bounds = array<i64: 8, 128>}, {pipeline_mode = #tpu.pipeline_mode<synchronous>, transform_indices = @transform_11, window_bounds = array<i64: 256, 128>}, {pipeline_mode = #tpu.pipeline_mode<synchronous>, transform_indices = @transform_12, window_bounds = array<i64: 1, 128>}, {pipeline_mode = #tpu.pipeline_mode<synchronous>, transform_indices = @transform_13, window_bounds = array<i64: 128, 128>}, {pipeline_mode = #tpu.pipeline_mode<synchronous>, transform_indices = @transform_14, window_bounds = array<i64: 1, 128>}, {pipeline_mode = #tpu.pipeline_mode<synchronous>, transform_indices = @transform_15, window_bounds = array<i64: 128, 128>}, {pipeline_mode = #tpu.pipeline_mode<synchronous>, transform_indices = @transform_16, window_bounds = array<i64: 1, 128>}, {transform_indices = @transform_17, window_bounds = array<i64: 48, 128>}]} {
    %c0 = arith.constant 0 : index
    %c0_0 = arith.constant 0 : index
    %0 = vector.load %arg1[%c0, %c0_0] : memref<48x8xf32, #tpu.memory_space<vmem>>, vector<48x8xf32>
    %c0_1 = arith.constant 0 : index
    %c0_2 = arith.constant 0 : index
    %1 = vector.load %arg3[%c0_1, %c0_2] : memref<48x4xf32, #tpu.memory_space<vmem>>, vector<48x4xf32>
    %c0_3 = arith.constant 0 : index
    %c0_4 = arith.constant 0 : index
    %c0_5 = arith.constant 0 : index
    %2 = vector.load %arg2[%c0_3, %c0_4, %c0_5] : memref<3x16x16xf32, #tpu.memory_space<vmem>>, vector<3x16x16xf32>
    %c0_6 = arith.constant 0 : index
    %c0_7 = arith.constant 0 : index
    %3 = vector.load %arg5[%c0_6, %c0_7] : memref<8x128xf32, #tpu.memory_space<vmem>>, vector<8x128xf32>
    %c0_8 = arith.constant 0 : index
    %c0_9 = arith.constant 0 : index
    %4 = vector.load %arg6[%c0_8, %c0_9] : memref<4x128xf32, #tpu.memory_space<vmem>>, vector<4x128xf32>
    %c0_10 = arith.constant 0 : index
    %c0_11 = arith.constant 0 : index
    %5 = vector.load %arg7[%c0_10, %c0_11] : memref<1x128xf32, #tpu.memory_space<vmem>>, vector<1x128xf32>
    %cst = arith.constant dense<0.000000e+00> : vector<48x128xf32>
    %6 = tpu.matmul %0, %3, %cst {dimension_numbers = #tpu.dot_dimension_numbers<[1], [0], [0], [1], [0, 0, 1, 1], [], []>} : vector<48x8xf32>, vector<8x128xf32>, vector<48x128xf32> -> vector<48x128xf32>
    %cst_12 = arith.constant dense<0.000000e+00> : vector<48x128xf32>
    %7 = tpu.matmul %1, %4, %cst_12 {dimension_numbers = #tpu.dot_dimension_numbers<[1], [0], [0], [1], [0, 0, 1, 1], [], []>} : vector<48x4xf32>, vector<4x128xf32>, vector<48x128xf32> -> vector<48x128xf32>
    %8 = arith.addf %6, %7 : vector<48x128xf32>
    %9 = vector.shape_cast %8 : vector<48x128xf32> to vector<3x16x128xf32>
    %cst_13 = arith.constant dense<0.000000e+00> : vector<3x16x128xf32>
    %10 = tpu.matmul %2, %9, %cst_13 {dimension_numbers = #tpu.dot_dimension_numbers<[2], [1], [1], [2], [0, 0, 0, 1, 1, 2], [0], [0]>} : vector<3x16x16xf32>, vector<3x16x128xf32>, vector<3x16x128xf32> -> vector<3x16x128xf32>
    %11 = vector.shape_cast %10 : vector<3x16x128xf32> to vector<48x128xf32>
    %12 = vector.broadcast %5 : vector<1x128xf32> to vector<48x128xf32>
    %13 = arith.addf %11, %12 : vector<48x128xf32>
    %14 = math.tanh %13 : vector<48x128xf32>
    %c0_14 = arith.constant 0 : index
    %c0_15 = arith.constant 0 : index
    %15 = vector.load %arg19[%c0_14, %c0_15] : memref<48x256xf32, #tpu.memory_space<vmem>>, vector<48x128xf32>
    tpu.vector_store %arg19[%c0_14, %c0_15], %14 {strides = array<i32>} : memref<48x256xf32, #tpu.memory_space<vmem>>, vector<48x128xf32>,
    %c0_16 = arith.constant 0 : index
    %c0_17 = arith.constant 0 : index
    %16 = vector.load %arg8[%c0_16, %c0_17] : memref<128x128xf32, #tpu.memory_space<vmem>>, vector<128x128xf32>
    %c0_18 = arith.constant 0 : index
    %c0_19 = arith.constant 0 : index
    %17 = vector.load %arg9[%c0_18, %c0_19] : memref<4x128xf32, #tpu.memory_space<vmem>>, vector<4x128xf32>
    %c0_20 = arith.constant 0 : index
    %c0_21 = arith.constant 0 : index
    %18 = vector.load %arg10[%c0_20, %c0_21] : memref<1x128xf32, #tpu.memory_space<vmem>>, vector<1x128xf32>
    %cst_22 = arith.constant dense<0.000000e+00> : vector<48x128xf32>
    %19 = tpu.matmul %14, %16, %cst_22 {dimension_numbers = #tpu.dot_dimension_numbers<[1], [0], [0], [1], [0, 0, 1, 1], [], []>} : vector<48x128xf32>, vector<128x128xf32>, vector<48x128xf32> -> vector<48x128xf32>
    %cst_23 = arith.constant dense<0.000000e+00> : vector<48x128xf32>
    %20 = tpu.matmul %1, %17, %cst_23 {dimension_numbers = #tpu.dot_dimension_numbers<[1], [0], [0], [1], [0, 0, 1, 1], [], []>} : vector<48x4xf32>, vector<4x128xf32>, vector<48x128xf32> -> vector<48x128xf32>
    %21 = arith.addf %19, %20 : vector<48x128xf32>
    %22 = vector.shape_cast %21 : vector<48x128xf32> to vector<3x16x128xf32>
    %cst_24 = arith.constant dense<0.000000e+00> : vector<3x16x128xf32>
    %23 = tpu.matmul %2, %22, %cst_24 {dimension_numbers = #tpu.dot_dimension_numbers<[2], [1], [1], [2], [0, 0, 0, 1, 1, 2], [0], [0]>} : vector<3x16x16xf32>, vector<3x16x128xf32>, vector<3x16x128xf32> -> vector<3x16x128xf32>
    %24 = vector.shape_cast %23 : vector<3x16x128xf32> to vector<48x128xf32>
    %25 = vector.broadcast %18 : vector<1x128xf32> to vector<48x128xf32>
    %26 = arith.addf %24, %25 : vector<48x128xf32>
    %27 = math.tanh %26 : vector<48x128xf32>
    %c0_25 = arith.constant 0 : index
    %c128 = arith.constant 128 : index
    %28 = vector.load %arg19[%c0_25, %c128] : memref<48x256xf32, #tpu.memory_space<vmem>>, vector<48x128xf32>
    tpu.vector_store %arg19[%c0_25, %c128], %27 {strides = array<i32>} : memref<48x256xf32, #tpu.memory_space<vmem>>, vector<48x128xf32>,
    %c0_26 = arith.constant 0 : index
    %c0_27 = arith.constant 0 : index
    %29 = vector.load %arg11[%c0_26, %c0_27] : memref<8x128xf32, #tpu.memory_space<vmem>>, vector<8x128xf32>
    %cst_28 = arith.constant dense<0.000000e+00> : vector<48x128xf32>
    %30 = tpu.matmul %0, %29, %cst_28 {dimension_numbers = #tpu.dot_dimension_numbers<[1], [0], [0], [1], [0, 0, 1, 1], [], []>} : vector<48x8xf32>, vector<8x128xf32>, vector<48x128xf32> -> vector<48x128xf32>
    %c0_29 = arith.constant 0 : index
    %c0_30 = arith.constant 0 : index
    %31 = vector.load %arg19[%c0_29, %c0_30] : memref<48x256xf32, #tpu.memory_space<vmem>>, vector<48x256xf32>
    %c0_31 = arith.constant 0 : index
    %c0_32 = arith.constant 0 : index
    %32 = vector.load %arg12[%c0_31, %c0_32] : memref<256x128xf32, #tpu.memory_space<vmem>>, vector<256x128xf32>
    %cst_33 = arith.constant dense<0.000000e+00> : vector<48x128xf32>
    %33 = tpu.matmul %31, %32, %cst_33 {dimension_numbers = #tpu.dot_dimension_numbers<[1], [0], [0], [1], [0, 0, 1, 1], [], []>} : vector<48x256xf32>, vector<256x128xf32>, vector<48x128xf32> -> vector<48x128xf32>
    %34 = arith.addf %30, %33 : vector<48x128xf32>
    %c0_34 = arith.constant 0 : index
    %c0_35 = arith.constant 0 : index
    %35 = vector.load %arg13[%c0_34, %c0_35] : memref<1x128xf32, #tpu.memory_space<vmem>>, vector<1x128xf32>
    %36 = vector.broadcast %35 : vector<1x128xf32> to vector<48x128xf32>
    %37 = arith.addf %34, %36 : vector<48x128xf32>
    %38 = arith.negf %37 : vector<48x128xf32>
    %39 = math.exp %38 : vector<48x128xf32>
    %cst_36 = arith.constant 1.000000e+00 : f32
    %40 = vector.broadcast %cst_36 : f32 to vector<48x128xf32>
    %41 = arith.addf %40, %39 : vector<48x128xf32>
    %42 = arith.divf %40, %41 : vector<48x128xf32>
    %43 = arith.mulf %37, %42 : vector<48x128xf32>
    %c0_37 = arith.constant 0 : index
    %c0_38 = arith.constant 0 : index
    %44 = vector.load %arg14[%c0_37, %c0_38] : memref<128x128xf32, #tpu.memory_space<vmem>>, vector<128x128xf32>
    %cst_39 = arith.constant dense<0.000000e+00> : vector<48x128xf32>
    %45 = tpu.matmul %43, %44, %cst_39 {dimension_numbers = #tpu.dot_dimension_numbers<[1], [0], [0], [1], [0, 0, 1, 1], [], []>} : vector<48x128xf32>, vector<128x128xf32>, vector<48x128xf32> -> vector<48x128xf32>
    %c0_40 = arith.constant 0 : index
    %c0_41 = arith.constant 0 : index
    %46 = vector.load %arg15[%c0_40, %c0_41] : memref<1x128xf32, #tpu.memory_space<vmem>>, vector<1x128xf32>
    %47 = vector.broadcast %46 : vector<1x128xf32> to vector<48x128xf32>
    %48 = arith.addf %45, %47 : vector<48x128xf32>
    %49 = arith.negf %48 : vector<48x128xf32>
    %50 = math.exp %49 : vector<48x128xf32>
    %cst_42 = arith.constant 1.000000e+00 : f32
    %51 = vector.broadcast %cst_42 : f32 to vector<48x128xf32>
    %52 = arith.addf %51, %50 : vector<48x128xf32>
    %53 = arith.divf %51, %52 : vector<48x128xf32>
    %54 = arith.mulf %48, %53 : vector<48x128xf32>
    %c0_43 = arith.constant 0 : index
    %c0_44 = arith.constant 0 : index
    %55 = vector.load %arg16[%c0_43, %c0_44] : memref<128x128xf32, #tpu.memory_space<vmem>>, vector<128x128xf32>
    %cst_45 = arith.constant dense<0.000000e+00> : vector<48x128xf32>
    %56 = tpu.matmul %54, %55, %cst_45 {dimension_numbers = #tpu.dot_dimension_numbers<[1], [0], [0], [1], [0, 0, 1, 1], [], []>} : vector<48x128xf32>, vector<128x128xf32>, vector<48x128xf32> -> vector<48x128xf32>
    %c0_46 = arith.constant 0 : index
    %c0_47 = arith.constant 0 : index
    %57 = vector.load %arg17[%c0_46, %c0_47] : memref<1x128xf32, #tpu.memory_space<vmem>>, vector<1x128xf32>
    %58 = vector.broadcast %57 : vector<1x128xf32> to vector<48x128xf32>
    %59 = arith.addf %56, %58 : vector<48x128xf32>
    %c0_48 = arith.constant 0 : index
    %c0_49 = arith.constant 0 : index
    %60 = vector.load %arg4[%c0_48, %c0_49] : memref<48x1xf32, #tpu.memory_space<vmem>>, vector<48x1xf32>
    %61 = vector.broadcast %60 : vector<48x1xf32> to vector<48x128xf32>
    %62 = arith.mulf %59, %61 : vector<48x128xf32>
    %c0_50 = arith.constant 0 : index
    %c0_51 = arith.constant 0 : index
    %63 = vector.load %arg18[%c0_50, %c0_51] : memref<48x128xf32, #tpu.memory_space<vmem>>, vector<48x128xf32>
    tpu.vector_store %arg18[%c0_50, %c0_51], %62 {strides = array<i32>} : memref<48x128xf32, #tpu.memory_space<vmem>>, vector<48x128xf32>,
    return
  }
  func.func @transform_0(%arg0: i32) -> (i32, i32) {
    %c0_i32 = arith.constant 0 : i32
    %c0_i32_0 = arith.constant 0 : i32
    return %arg0, %c0_i32 : i32, i32
  }
  func.func @transform_1(%arg0: i32) -> (i32, i32, i32) {
    %c0_i32 = arith.constant 0 : i32
    %c0_i32_0 = arith.constant 0 : i32
    %c0_i32_1 = arith.constant 0 : i32
    return %arg0, %c0_i32, %c0_i32_0 : i32, i32, i32
  }
  func.func @transform_2(%arg0: i32) -> (i32, i32) {
    %c0_i32 = arith.constant 0 : i32
    %c0_i32_0 = arith.constant 0 : i32
    return %arg0, %c0_i32 : i32, i32
  }
  func.func @transform_3(%arg0: i32) -> (i32, i32) {
    %c0_i32 = arith.constant 0 : i32
    %c0_i32_0 = arith.constant 0 : i32
    return %arg0, %c0_i32 : i32, i32
  }
  func.func @transform_4(%arg0: i32) -> (i32, i32) {
    %c0_i32 = arith.constant 0 : i32
    %c0_i32_0 = arith.constant 0 : i32
    %c0_i32_1 = arith.constant 0 : i32
    return %c0_i32, %c0_i32_0 : i32, i32
  }
  func.func @transform_5(%arg0: i32) -> (i32, i32) {
    %c0_i32 = arith.constant 0 : i32
    %c0_i32_0 = arith.constant 0 : i32
    %c0_i32_1 = arith.constant 0 : i32
    return %c0_i32, %c0_i32_0 : i32, i32
  }
  func.func @transform_6(%arg0: i32) -> (i32, i32) {
    %c0_i32 = arith.constant 0 : i32
    %c0_i32_0 = arith.constant 0 : i32
    %c0_i32_1 = arith.constant 0 : i32
    return %c0_i32, %c0_i32_0 : i32, i32
  }
  func.func @transform_7(%arg0: i32) -> (i32, i32) {
    %c0_i32 = arith.constant 0 : i32
    %c0_i32_0 = arith.constant 0 : i32
    %c0_i32_1 = arith.constant 0 : i32
    return %c0_i32, %c0_i32_0 : i32, i32
  }
  func.func @transform_8(%arg0: i32) -> (i32, i32) {
    %c0_i32 = arith.constant 0 : i32
    %c0_i32_0 = arith.constant 0 : i32
    %c0_i32_1 = arith.constant 0 : i32
    return %c0_i32, %c0_i32_0 : i32, i32
  }
  func.func @transform_9(%arg0: i32) -> (i32, i32) {
    %c0_i32 = arith.constant 0 : i32
    %c0_i32_0 = arith.constant 0 : i32
    %c0_i32_1 = arith.constant 0 : i32
    return %c0_i32, %c0_i32_0 : i32, i32
  }
  func.func @transform_10(%arg0: i32) -> (i32, i32) {
    %c0_i32 = arith.constant 0 : i32
    %c0_i32_0 = arith.constant 0 : i32
    %c0_i32_1 = arith.constant 0 : i32
    return %c0_i32, %c0_i32_0 : i32, i32
  }
  func.func @transform_11(%arg0: i32) -> (i32, i32) {
    %c0_i32 = arith.constant 0 : i32
    %c0_i32_0 = arith.constant 0 : i32
    %c0_i32_1 = arith.constant 0 : i32
    return %c0_i32, %c0_i32_0 : i32, i32
  }
  func.func @transform_12(%arg0: i32) -> (i32, i32) {
    %c0_i32 = arith.constant 0 : i32
    %c0_i32_0 = arith.constant 0 : i32
    %c0_i32_1 = arith.constant 0 : i32
    return %c0_i32, %c0_i32_0 : i32, i32
  }
  func.func @transform_13(%arg0: i32) -> (i32, i32) {
    %c0_i32 = arith.constant 0 : i32
    %c0_i32_0 = arith.constant 0 : i32
    %c0_i32_1 = arith.constant 0 : i32
    return %c0_i32, %c0_i32_0 : i32, i32
  }
  func.func @transform_14(%arg0: i32) -> (i32, i32) {
    %c0_i32 = arith.constant 0 : i32
    %c0_i32_0 = arith.constant 0 : i32
    %c0_i32_1 = arith.constant 0 : i32
    return %c0_i32, %c0_i32_0 : i32, i32
  }
  func.func @transform_15(%arg0: i32) -> (i32, i32) {
    %c0_i32 = arith.constant 0 : i32
    %c0_i32_0 = arith.constant 0 : i32
    %c0_i32_1 = arith.constant 0 : i32
    return %c0_i32, %c0_i32_0 : i32, i32
  }
  func.func @transform_16(%arg0: i32) -> (i32, i32) {
    %c0_i32 = arith.constant 0 : i32
    %c0_i32_0 = arith.constant 0 : i32
    %c0_i32_1 = arith.constant 0 : i32
    return %c0_i32, %c0_i32_0 : i32, i32
  }
  func.func @transform_17(%arg0: i32) -> (i32, i32) {
    %c0_i32 = arith.constant 0 : i32
    %c0_i32_0 = arith.constant 0 : i32
    return %arg0, %c0_i32 : i32, i32
  }
}

</mosaic_0001>

<bundles_post_ra>
// kernel: tpu_custom_call.1
= control target key start
LH: loop header
LB: loop body
LE: loop exit
PB: predicated region body
PF: predicated region fallthrough
CT: control target
= control target key end

     0   :  { %s2778_s0 = inlined_call_operand.vmem [shape: f32[96,8], index: 0, kind: input, shape index: {}]   ;;  %s2779_s1 = inlined_call_operand.hbm [shape: f32[6,16,16], index: 1, kind: input, shape index: {}]   ;;  %s2780_s2 = inlined_call_operand.vmem [shape: f32[96,4], index: 2, kind: input, shape index: {}]   ;;  %s2781_s3 = inlined_call_operand.vmem [shape: f32[96,1], index: 3, kind: input, shape index: {}]   ;;  %s2782_s4 = inlined_call_operand.vmem [shape: f32[8,128], index: 4, kind: input, shape index: {}]   ;;  %s2783_s5 = inlined_call_operand.vmem [shape: f32[4,128], index: 5, kind: input, shape index: {}]   ;;  %s2784_s6 = inlined_call_operand.vmem [shape: f32[1,128], index: 6, kind: input, shape index: {}]   ;;  %s2785_s7 = inlined_call_operand.vmem [shape: f32[128,128], index: 7, kind: input, shape index: {}]   ;;  %s2786_s8 = inlined_call_operand.vmem [shape: f32[4,128], index: 8, kind: input, shape index: {}]   ;;  %s2787_s9 = inlined_call_operand.vmem [shape: f32[1,128], index: 9, kind: input, shape index: {}]   ;;  %s2788_s10 = inlined_call_operand.vmem [shape: f32[8,128], index: 10, kind: input, shape index: {}]   ;;  %s2789_s11 = inlined_call_operand.hbm [shape: f32[256,128], index: 11, kind: input, shape index: {}]   ;;  %s2790_s12 = inlined_call_operand.vmem [shape: f32[1,128], index: 12, kind: input, shape index: {}]   ;;  %s2791_s13 = inlined_call_operand.vmem [shape: f32[128,128], index: 13, kind: input, shape index: {}]   ;;  %s2792_s14 = inlined_call_operand.vmem [shape: f32[1,128], index: 14, kind: input, shape index: {}]   ;;  %s2793_s15 = inlined_call_operand.hbm [shape: f32[128,128], index: 15, kind: input, shape index: {}]   ;;  %s2794_s16 = inlined_call_operand.vmem [shape: f32[1,128], index: 16, kind: input, shape index: {}]   ;;  %s2795_s17 = inlined_call_operand.hbm [shape: f32[96,128], index: 17, kind: output, shape index: {}]  }
   0x1   :  { %2808 = sst [smem:[#allocation20_spill]] %s2778_s0 }
   0x2   :  { %2809 = sst [smem:[#allocation21_spill]] %s2779_s1 }
   0x3   :  { %2810 = sst [smem:[#allocation22_spill]] %s2781_s3 }
   0x4   :  { %2811 = sst [smem:[#allocation23_spill]] %s2789_s11 }
   0x5   :  { %2812 = sst [smem:[#allocation24_spill]] %s2793_s15 }
   0x6   :  { %2813 = sst [smem:[#allocation25_spill]] %s2794_s16 }
   0x7   :  { %2814 = sst [smem:[#allocation26_spill]] %s2795_s17 }
   0x8   :  { %22 = vsyncpa [#allocation4], 0 }
   0x9   :  { %24 = vsyncpa [#allocation4 + $0x1], 0 }
   0xa   :  { %25 = vsyncpa [#allocation7], 0 }
   0xb   :  { %26 = vsyncpa [#allocation5], 0 }
   0xc   :  { %28 = vsyncpa [#allocation5 + $0x1], 0  ;;  %s2295_s24 = smov 0   ;;  %s2297_s25 = smov 0  }
   0xd   :  { %s2299_s26 = smov 0   ;;  %s2301_s27 = smov 0  }
   0xe LB: > { %2815 = sst [smem:[#allocation13_spill]] %s2184_s24  ;;  %s2316_s28 = sadd.s32 4294967295, %s2196_s27   ;;  %s2196_s27 = sphi %s2301_s27, %s2841_s27   ;;  %s2192_s26 = sphi %s2299_s26, %s2843_s26   ;;  %s2188_s25 = sphi %s2297_s25, %s2845_s25   ;;  %s2184_s24 = sphi %s2295_s24, %s2844_s24  }
   0xf   : > { %2816 = sst [smem:[#allocation14_spill]] %s2192_s26  ;;  %s1796_s29 = sadd.s32 4294967294, %s2196_s27  }
  0x10   : > { %2817 = sst [smem:[#allocation15_spill]] %s2196_s27  ;;  %p80_p0 = scmp.ne.s32.totalorder %s2188_s25, %s2184_s24 }
  0x11   : > { %p81_p1 = scmp.eq.s32.totalorder %s2316_s28, 0  ;;  %p429_p2 = scmp.eq.s32.totalorder %s2316_s28, 1 }
  0x12   : > { %p435_p3 = scmp.eq.s32.totalorder %s1796_s29, 1  ;;  %p1797_p5 = scmp.ge.s32.totalorder %s2196_s27, 1 }
  0x13   : > { %p2325_p4 = por %p81_p1, %p80_p0  ;;  %p442_p7 = scmp.lt.s32.totalorder %s2196_s27, 3 }
  0x14   : > { %p2330_p6 = por %p435_p3, %p80_p0  ;;  %s2821_s11 = sld [smem:[#allocation23_spill]] }
  0x15   : > { %p2338_p8 = pnand %p1797_p5, %p442_p7  ;;  %s2198_s21 = smov [#allocation6]  }
  0x16   : > { %s2819_s30 = scalar_select %p2330_p6, 1, 0 }
  0x17   : > { %p1896_p9 = pneg %p2338_p8  ;;  %s476_s22 = sshll.u32 %s2198_s21, 4  ;;  %s477_s22 = int_to_ptr.vmem [resolvable:$true] %s476_s22 }
  0x18   : > { %2820 = sst [smem:[#allocation16_spill]] %s2819_s30  ;;  %s2799_s19 = smov 128  }
  0x19   : > { %p1897_p10 = pnand %p1896_p9, %p81_p1  ;;  %s2823_s15 = sld [smem:[#allocation24_spill]] }
  0x1a   : > { %s474_s1 = sshll.u32 %s2821_s11, 4  ;;  %s2800_s11 = smov 8   ;;  %s475_s1 = int_to_ptr.hbm [resolvable:$true] %s474_s1 }
  0x1b   : > { %1899 = dma.hbm_to_vmem [thread:$0]  (!%p1897_p10), %s475_s1, 4096, %s477_s22, [#allocation7], %s2799_s19, %s2799_s19, %s2800_s11  }
  0x1c   : > { %s2201_s21 = smov [#allocation8]   ;;  %s2357_s23 = sadd.s32 1, %s2196_s27  }
  0x1d   : > { %s499_s30 = sshll.u32 %s2201_s21, 4  ;;  %2824 = sst [smem:[#allocation17_spill]] %s2357_s23  ;;  %s500_s30 = int_to_ptr.vmem [resolvable:$true] %s499_s30 }
  0x1e   : > { %s67_s29 = sadd.s32 1, %s2192_s26  ;;  %p74_p12 = scmp.ne.s32.totalorder %s2192_s26, %s2188_s25 }
  0x1f   : > { %s497_s18 = sshll.u32 %s2823_s15, 4  ;;  %s64_s15 = ssub.s32 %s2196_s27, %s2357_s23  ;;  %s498_s18 = int_to_ptr.hbm [resolvable:$true] %s497_s18 }
  0x20   : > { %1902 = dma.hbm_to_vmem [thread:$0]  (!%p1897_p10), %s498_s18, 2048, %s500_s30, [#allocation7], %s2799_s19, %s2799_s19, %s2800_s11  }
  0x21   : > { %p65_p13 = scmp.eq.s32.totalorder %s64_s15, 0  ;;  %p75_p0 = scmp.eq.s32.totalorder %s2196_s27, 0 }
  0x22   : > { %p2367_p3 = por %p429_p2, %p74_p12  ;;  %p1913_p5 = scmp.lt.s32.totalorder %s2196_s27, 2 }
  0x23   : > { %s2373_s1 = scalar_select %p65_p13, %s2192_s26, %s67_s29  }
  0x24   : > { %s2825_s24 = scalar_select %p2367_p3, 1, 0 }
  0x25   : > { %2827 = sst [smem:[#allocation19_spill]] %s2373_s1  ;;  %p76_p7 = por %p75_p0, %p74_p12 }
  0x26   : > { %2826 = sst [smem:[#allocation18_spill]] %s2825_s24  ;;  %s525_s22 = sand.u32 1, %s2192_s26  }
  0x27   : > { %s1882_s21 = smul.u32 48, %s525_s22  ;;  %p2377_p9 = pnand %p1913_p5, %p76_p7 }
  0x28   : > { %s1865_s30 = smul.u32 48, %s2196_s27  ;;  %s2829_s15 = sld [smem:[#allocation21_spill]] }
  0x29   : > { %s529_s17 = scalar_lea.vmem [#allocation3], %s1882_s21  ;;  %s526_s29 = scalar_lea.sflag [#allocation4], %s525_s22 }
  0x2a   : > { %s538_s16 = sshll.u32 %s529_s17, 4  ;;  %p2100_p10 = pneg %p2377_p9  ;;  %s539_s16 = int_to_ptr.vmem [resolvable:$true] %s538_s16 }
  0x2e   : > { %s535_s23 = scalar_lea.hbm %s2829_s15, %s1865_s30  ;;  %s2103_s11 = scalar_lea.hbm %s2829_s15, 96 }
  0x2f   : > { %s536_s3 = sshll.u32 %s535_s23, 4  ;;  %s537_s3 = int_to_ptr.hbm [resolvable:$true] %s536_s3 }
  0x30   : > { %s2096_s1 = sshra.s32 %s537_s3, 4  ;;  %s2097_s1 = int_to_ptr.hbm [resolvable:$true] %s2096_s1 }
  0x31   : > { %s2098_s26 = scalar_lea.hbm %s2097_s1, 48  ;;  %p2104_p0 = scmp.lt.s32.totalorder %s2097_s1, %s2829_s15 }
  0x32   : > { %p2099_p2 = scmp.ne.s32.totalorder %s2097_s1, %s2098_s26  ;;  %p2105_p5 = scmp.lt.s32.totalorder %s2103_s11, %s2098_s26 }
  0x34   : > { %p2101_p12 = pnand %p2100_p10, %p2099_p2  ;;  %p2106_p7 = por %p2105_p5, %p2104_p0 }
  0x36   : > { %p2102_p13 = pneg %p2101_p12 }
  0x38   : > { %p2107_p11 = pnand %p2106_p7, %p2102_p13 }
  0x3a   : > { %2110 = shalt.err (!%p2107_p11)
}
  0x3b   : > { %s2830_s17 = smov 8   ;;  %s2831_s23 = smov 128  }
  0x3c   : > { %1906 = dma.hbm_to_vmem [thread:$0]  (!%p2377_p9), %s537_s3, 768, %s539_s16, %s526_s29, %s2831_s23, %s2831_s23, %s2830_s17  }
  0x3d   : > { %568 = sbr.rel (%p2338_p8) target bundleno = 1138 (0x472), region = 88  ;;  %s2400_s24 = sand.u32 (!%p2338_p8), 1, %s2188_s25  }
  0x3e   : > { %s1883_s26 = smul.u32 (!%p2338_p8), 48, %s2400_s24  ;;  %s571_s27 = scalar_lea.sflag (!%p2338_p8), [#allocation4], %s2400_s24 }
  0x40   : > { %s2406_s1 = scalar_lea.vmem (!%p2338_p8), [#allocation3], %s1883_s26 }
  0x42   : > { %2171 = dma.done.wait (%p2325_p4), %s571_s27, 768  }
  0x43   : > { %2173 = vsyncadd (%p2325_p4), %s571_s27, 4294966528 }
  0x44   : > { %2175 = dma.done.wait (%p81_p1), [#allocation7], 6144  }
  0x45   : > { %2177 = vsyncadd (%p81_p1), [#allocation7], 4294961152  ;;  %s651_s3 = smul.u32 6, %s2316_s28  ;;  %vm711_vm0 = vcmask 1043456   ;;  %vm692_vm1 = vcmask 31744   ;;  %vm750_vm2 = vcmask 64512  }
  0x46   : > { %v690_v0 = vld [vmem:[%s2783_s5] sm:$0xf]  ;;  %s2832_s17 = sld [smem:[#allocation20_spill]]  ;;  %vm804_vm3 = vcmask 130048   ;;  %v2488_v23 = vld [vmem:[%s2406_s1 + $0x8] sm:$0xff]  ;;  %v927_v32 = vld [vmem:[%s2785_s7 + $0x70] sm:$0xff] }
  0x47   : > { %p652_p8 = scmp.lt.s32.totalorder %s651_s3, 11  ;;  %v689_v1 = vld [vmem:[%s2782_s4] sm:$0xff]  ;;  %1809 = vmatpush.msk.msra.mxu0 %vm711_vm0, %v690_v0  ;;  %v928_v30 = vld [vmem:[%s2785_s7 + $0x78] sm:$0xff]  ;;  %v1121_v33 = vld [vmem:[#allocation6 + $0x70] sm:$0xff]  ;;  %s2833_s19 = sld [smem:[#allocation22_spill]] }
  0x48   : > { %784 = vmatpush.msra.mxu1 %v689_v1  ;;  %v2483_v20 = vld [vmem:[%s2406_s1] sm:$0xff]  ;;  %v2493_v28 = vld [vmem:[%s2406_s1 + $0x10] sm:$0xff]  ;;  %v1122_v31 = vld [vmem:[#allocation6 + $0x78] sm:$0xff]  ;;  %s2835_s20 = sld [smem:[#allocation26_spill]]  ;;  %s1653_s29 = scalar_lea.sflag [#allocation5], %s2400_s24 }
  0x49   : > { %s2847_s3 = smov (!%p652_p8, %s651_s3), 11  ;;  %v929_v29 = vld [vmem:[%s2786_s8] sm:$0xf]  ;;  %969 = vmatpush.msrb.mxu0 %v928_v30  ;;  %v926_v36 = vld [vmem:[%s2785_s7 + $0x68] sm:$0xff]  ;;  %v924_v41 = vld [vmem:[%s2785_s7 + $0x58] sm:$0xff] }
  0x4a   : > { %s2417_s16 = sshll.u32 %s2847_s3, 3  ;;  %v1120_v37 = vld [vmem:[#allocation6 + $0x68] sm:$0xff]  ;;  %v925_v38 = vld [vmem:[%s2785_s7 + $0x60] sm:$0xff]  ;;  %v1118_v42 = vld [vmem:[#allocation6 + $0x58] sm:$0xff] }
  0x4b   : > { %s662_s11 = scalar_lea.vmem %s2780_s2, %s2417_s16  ;;  %970 = vmatpush.msrb.mxu0 %v927_v32  ;;  %v2514_v39 = vld [vmem:[%s2406_s1 + $0x18] sm:$0xff]  ;;  %v1119_v40 = vld [vmem:[#allocation6 + $0x60] sm:$0xff]  ;;  %v923_v43 = vld [vmem:[%s2785_s7 + $0x50] sm:$0xff] }
  0x4c   : > { %s655_s23 = scalar_lea.vmem %s2832_s17, %s2417_s16  ;;  %v2434_v2 = vld [vmem:[%s662_s11] sm:$0xff]  ;;  %v2442_v4 = vld [vmem:[%s662_s11 + $0x8] sm:$0xff]  ;;  %v2450_v6 = vld [vmem:[%s662_s11 + $0x10] sm:$0xff]  ;;  %s2834_s17 = sld [smem:[#allocation25_spill]] }
  0x4d   : > { %v2436_v3 = vld [vmem:[%s655_s23] sm:$0xff]  ;;  %1810 = vmatmul.msk.f32.vlgmr.msra.gmra.mxu0 %vm692_vm1, %v2434_v2  ;;  %v2444_v5 = vld [vmem:[%s655_s23 + $0x8] sm:$0xff]  ;;  %v2452_v7 = vld [vmem:[%s655_s23 + $0x10] sm:$0xff]  ;;  %s2705_s30 = scalar_lea.vmem %s2833_s19, %s2417_s16 }
  0x4e   : > { %1816 = vmatmul.msk.f32.vlgmr.msra.gmra.mxu1 %vm750_vm2, %v2436_v3  ;;  %v2458_v8 = vld [vmem:[%s662_s11 + $0x18] sm:$0xff]  ;;  %v2466_v10 = vld [vmem:[%s662_s11 + $0x20] sm:$0xff]  ;;  %v2474_v12 = vld [vmem:[%s662_s11 + $0x28] sm:$0xff]  ;;  %971 = vmatpush.msrb.mxu0 %v926_v36  ;;  %s2146_s16 = scalar_lea.hbm %s2835_s20, 96 }
  0x4f   : > { %v2460_v9 = vld [vmem:[%s655_s23 + $0x18] sm:$0xff]  ;;  %v2468_v11 = vld [vmem:[%s655_s23 + $0x20] sm:$0xff]  ;;  %v2476_v13 = vld [vmem:[%s655_s23 + $0x28] sm:$0xff]  ;;  %s2736_s23 = scalar_lea.vmem [#allocation9], %s1883_s26  ;;  %s1864_s26 = smul.u32 48, %s2316_s28 }
  0x50   : > { %972 = vmatpush.msrb.mxu0 %v925_v38  ;;  %v1117_v46 = vld [vmem:[#allocation6 + $0x50] sm:$0xff]  ;;  %v922_v48 = vld [vmem:[%s2785_s7 + $0x48] sm:$0xff]  ;;  %v921_v52 = vld [vmem:[%s2785_s7 + $0x40] sm:$0xff]  ;;  %s1665_s21 = sshll.u32 %s2736_s23, 4  ;;  %s1666_s21 = int_to_ptr.vmem [resolvable:$true] %s1665_s21 }
  0x51   : > { %v1116_v49 = vld [vmem:[#allocation6 + $0x48] sm:$0xff]  ;;  %v2528_v51 = vld [vmem:[%s2406_s1 + $0x20] sm:$0xff]  ;;  %v920_v54 = vld [vmem:[%s2785_s7 + $0x38] sm:$0xff]  ;;  %s1664_s22 = scalar_lea.hbm %s2835_s20, %s1864_s26 }
  0x52   : > { %973 = vmatpush.msrb.mxu0 %v924_v41  ;;  %v1115_v53 = vld [vmem:[#allocation6 + $0x40] sm:$0xff]  ;;  %v1114_v55 = vld [vmem:[#allocation6 + $0x38] sm:$0xff]  ;;  %v919_v56 = vld [vmem:[%s2785_s7 + $0x30] sm:$0xff]  ;;  %s1667_s18 = sshll.u32 %s1664_s22, 4  ;;  %s1668_s18 = int_to_ptr.hbm [resolvable:$true] %s1667_s18 }
  0x53   : > { %v1113_v57 = vld [vmem:[#allocation6 + $0x30] sm:$0xff]  ;;  %v918_v58 = vld [vmem:[%s2785_s7 + $0x28] sm:$0xff]  ;;  %v917_v61 = vld [vmem:[%s2785_s7 + $0x20] sm:$0xff]  ;;  %s2140_s11 = sshra.s32 %s1668_s18, 4  ;;  %s2141_s11 = int_to_ptr.hbm [resolvable:$true] %s2140_s11 }
  0x54   : > { %974 = vmatpush.msrb.mxu0 %v923_v43  ;;  %v1112_v59 = vld [vmem:[#allocation6 + $0x28] sm:$0xff]  ;;  %v1111_v62 = vld [vmem:[#allocation6 + $0x20] sm:$0xff]  ;;  %v916_v63 = vld [vmem:[%s2785_s7 + $0x18] sm:$0xff]  ;;  %s2142_s28 = scalar_lea.hbm %s2141_s11, 48  ;;  %p2147_p9 = scmp.lt.s32.totalorder %s2141_s11, %s2835_s20 }
  0x55   : > { %1811 = vmatmul.msk.f32.gmra.mxu0 %vm692_vm1, %v2442_v4  ;;  %v2547_v60 = vld [vmem:[%s2406_s1 + $0x28] sm:$0xff]  ;;  %v915_v1 = vld [vmem:[%s2785_s7 + $0x10] sm:$0xff]  ;;  %p2143_p1 = scmp.ne.s32.totalorder %s2141_s11, %s2142_s28  ;;  %p2148_p2 = scmp.lt.s32.totalorder %s2146_s16, %s2142_s28 }
  0x56   : > { %1817 = vmatmul.msk.f32.gmra.mxu1 %vm750_vm2, %v2444_v5  ;;  %975 = vmatpush.msrb.mxu0 %v922_v48  ;;  %v1110_v0 = vld [vmem:[#allocation6 + $0x18] sm:$0xff] }
  0x57   : > { %v1138_v48 = vld [vmem:[#allocation6 + $0xf8] sm:$0xff]  ;;  %p2144_p4 = pnand %p2143_p1, %p2367_p3  ;;  %p2149_p10 = por %p2148_p2, %p2147_p9 }
  0x58   : > { %976 = vmatpush.msrb.mxu0 %v921_v52 }
  0x59   : > { %p2145_p11 = pneg %p2144_p4 }
  0x5a   : > { %977 = vmatpush.msrb.mxu0 %v920_v54  ;;  %v1134_v54 = vld [vmem:[#allocation6 + $0xd8] sm:$0xff] }
  0x5b   : > { %p2150_p12 = pnand %p2149_p10, %p2145_p11 }
  0x5c   : > { %978 = vmatpush.msrb.mxu0 %v919_v56 }
  0x5d   : > { %1812 = vmatmul.msk.f32.gmra.mxu0 %vm692_vm1, %v2450_v6 }
  0x5e   : > { %1818 = vmatmul.msk.f32.gmra.mxu1 %vm750_vm2, %v2452_v7  ;;  %979 = vmatpush.msrb.mxu0 %v918_v58 }
  0x60   : > { %980 = vmatpush.msrb.mxu0 %v917_v61  ;;  %v1130_v61 = vld [vmem:[#allocation6 + $0xb8] sm:$0xff] }
  0x62   : > { %981 = vmatpush.msrb.mxu0 %v916_v63  ;;  %v1127_v63 = vld [vmem:[#allocation6 + $0xa0] sm:$0xff] }
  0x64   : > { %982 = vmatpush.msrb.mxu0 %v915_v1  ;;  %v1125_v1 = vld [vmem:[#allocation6 + $0x90] sm:$0xff] }
  0x65   : > { %1813 = vmatmul.msk.f32.gmra.mxu0 %vm692_vm1, %v2458_v8 }
  0x66   : > { %1819 = vmatmul.msk.f32.gmra.mxu1 %vm750_vm2, %v2460_v9 }
  0x6d   : > { %1814 = vmatmul.msk.f32.gmra.mxu0 %vm692_vm1, %v2466_v10 }
  0x6e   : > { %1820 = vmatmul.msk.f32.gmra.mxu1 %vm750_vm2, %v2468_v11 }
  0x75   : > { %1815 = vmatmul.msk.f32.gmra.mxu0 %vm692_vm1, %v2474_v12 }
  0x76   : > { %1821 = vmatmul.msk.f32.gmra.mxu1 %vm750_vm2, %v2476_v13 }
  0xca   : > { %v732_v14 = vpop.f32.mrf.mxu0 }
  0xcb   : > { %v786_v15 = vpop.f32.mrf.mxu1 }
  0xcc   : > { %v787_v19 = vadd.f32 %v786_v15, %v732_v14 }
  0xd2   : > { %v735_v16 = vpop.f32.mrf.mxu0 }
  0xd3   : > { %v789_v17 = vpop.f32.mrf.mxu1 }
  0xd4   : > { %v790_v18 = vadd.f32 %v789_v17, %v735_v16 }
  0xd6   : > { %825 = vmatpush.msra.mxu2 %v790_v18 }
  0xd8   : > { %826 = vmatpush.msra.mxu2 %v787_v19 }
  0xd9   : > { %1822 = vmatmul.msk.f32.vlgmr.msra.gmra.mxu2 %vm804_vm3, %v2483_v20 }
  0xda   : > { %v738_v21 = vpop.f32.mrf.mxu0 }
  0xdb   : > { %v792_v22 = vpop.f32.mrf.mxu1 }
  0xdc   : > { %v793_v27 = vadd.f32 %v792_v22, %v738_v21 }
  0xe1   : > { %1823 = vmatmul.msk.f32.gmra.mxu2 %vm804_vm3, %v2488_v23 }
  0xe2   : > { %v741_v24 = vpop.f32.mrf.mxu0 }
  0xe3   : > { %v795_v25 = vpop.f32.mrf.mxu1 }
  0xe4   : > { %v796_v26 = vadd.f32 %v795_v25, %v741_v24 }
  0xe6   : > { %854 = vmatpush.msra.mxu3 %v796_v26 }
  0xe8   : > { %855 = vmatpush.msra.mxu3 %v793_v27 }
  0xe9   : > { %1824 = vmatmul.msk.f32.vlgmr.msra.gmra.mxu3 %vm804_vm3, %v2493_v28 }
  0xea   : > { %1828 = vmatpush.msk.msrb.mxu3 %vm711_vm0, %v929_v29  ;;  %v744_v34 = vpop.f32.mrf.mxu0 }
  0xeb   : > { %v798_v35 = vpop.f32.mrf.mxu1 }
  0xec   : > { %1139 = vmatpush.msra.mxu3 %v1122_v31  ;;  %v799_v50 = vadd.f32 %v798_v35, %v744_v34 }
  0xee   : > { %1140 = vmatpush.msra.mxu3 %v1121_v33 }
  0xf0   : > { %1141 = vmatpush.msra.mxu3 %v1120_v37 }
  0xf1   : > { %1825 = vmatmul.msk.f32.gmra.mxu3 %vm804_vm3, %v2514_v39 }
  0xf2   : > { %1142 = vmatpush.msra.mxu3 %v1119_v40  ;;  %v747_v44 = vpop.f32.mrf.mxu0 }
  0xf3   : > { %v801_v45 = vpop.f32.mrf.mxu1 }
  0xf4   : > { %v802_v47 = vadd.f32 %v801_v45, %v747_v44  ;;  %1143 = vmatpush.msra.mxu3 %v1118_v42 }
  0xf6   : > { %883 = vmatpush.msrb.mxu2 %v802_v47  ;;  %1144 = vmatpush.msra.mxu3 %v1117_v46 }
  0xf8   : > { %884 = vmatpush.msrb.mxu2 %v799_v50  ;;  %1145 = vmatpush.msra.mxu3 %v1116_v49  ;;  %v1137_v50 = vld [vmem:[#allocation6 + $0xf0] sm:$0xff] }
  0xf9   : > { %1826 = vmatmul.msk.f32.vlgmr.msrb.gmra.mxu2 %vm804_vm3, %v2528_v51  ;;  %1829 = vmatmul.msk.f32.vlgmr.msrb.gmra.mxu3 %vm692_vm1, %v2434_v2  ;;  %v1109_v2 = vld [vmem:[#allocation6 + $0x10] sm:$0xff] }
  0xfa   : > { %1146 = vmatpush.msra.mxu3 %v1115_v53  ;;  %v1136_v53 = vld [vmem:[#allocation6 + $0xe8] sm:$0xff] }
  0xfc   : > { %1147 = vmatpush.msra.mxu3 %v1114_v55 }
  0xfe   : > { %1148 = vmatpush.msra.mxu3 %v1113_v57  ;;  %v1132_v57 = vld [vmem:[#allocation6 + $0xc8] sm:$0xff] }
 0x100   : > { %1149 = vmatpush.msra.mxu3 %v1112_v59 }
 0x101   : > { %1827 = vmatmul.msk.f32.gmra.mxu2 %vm804_vm3, %v2547_v60  ;;  %1830 = vmatmul.msk.f32.gmra.mxu3 %vm692_vm1, %v2442_v4  ;;  %v914_v4 = vld [vmem:[%s2785_s7 + $0x8] sm:$0xff] }
 0x102   : > { %1150 = vmatpush.msra.mxu3 %v1111_v62  ;;  %983 = vmatpush.msrb.mxu0 %v914_v4  ;;  %v1129_v62 = vld [vmem:[#allocation6 + $0xb0] sm:$0xff]  ;;  %v1124_v4 = vld [vmem:[#allocation6 + $0x88] sm:$0xff] }
 0x104   : > { %1151 = vmatpush.msra.mxu3 %v1110_v0  ;;  %v1126_v0 = vld [vmem:[#allocation6 + $0x98] sm:$0xff] }
 0x106   : > { %1152 = vmatpush.msra.mxu3 %v1109_v2  ;;  %v1094_v2 = vld [vmem:[%s2788_s10] sm:$0xff] }
 0x109   : > { %1831 = vmatmul.msk.f32.gmra.mxu3 %vm692_vm1, %v2450_v6  ;;  %v1108_v6 = vld [vmem:[#allocation6 + $0x8] sm:$0xff] }
 0x10a   : > { %1153 = vmatpush.msra.mxu3 %v1108_v6 }
 0x111   : > { %1832 = vmatmul.msk.f32.gmra.mxu3 %vm692_vm1, %v2458_v8  ;;  %v913_v8 = vld [vmem:[%s2785_s7] sm:$0xff] }
 0x112   : > { %984 = vmatpush.msrb.mxu0 %v913_v8 }
 0x119   : > { %1833 = vmatmul.msk.f32.gmra.mxu3 %vm692_vm1, %v2466_v10  ;;  %v1107_v10 = vld [vmem:[#allocation6] sm:$0xff] }
 0x11a   : > { %1154 = vmatpush.msra.mxu3 %v1107_v10 }
 0x121   : > { %1834 = vmatmul.msk.f32.gmra.mxu3 %vm692_vm1, %v2474_v12  ;;  %v1959_v12 = vld [vmem:[%s2784_s6] ss:$0 sm:$0xff] }
 0x15c   : > { %v828_v14 = vpop.f32.mrf.mxu2 }
 0x15d   : > { %v895_v15 = vadd.f32 %v1959_v12, %v828_v14 }
 0x15f   : > { %1964 = vtanh.f32 %v895_v15 }
 0x164   : > { %v831_v16 = vpop.f32.mrf.mxu2 }
 0x165   : > { %v1965_v17 = vpop.eup %1964  ;;  %v896_v18 = vadd.f32 %v1959_v12, %v831_v16 }
 0x166   : > { %985 = vmatmul.f32.vlgmr.msrb.gmra.mxu0 %v1965_v17  ;;  %1155 = vmatmul.f32.vlgmr.msra.gmra.mxu3 %v1965_v17 }
 0x167   : > { %1966 = vtanh.f32 %v896_v18 }
 0x16c   : > { %v857_v19 = vpop.f32.mrf.mxu3 }
 0x16d   : > { %v1967_v21 = vpop.eup %1966  ;;  %v897_v22 = vadd.f32 %v1959_v12, %v857_v19 }
 0x16e   : > { %988 = vmatmul.f32.gmra.mxu0 %v1967_v21  ;;  %1158 = vmatmul.f32.gmra.mxu3 %v1967_v21 }
 0x16f   : > { %1968 = vtanh.f32 %v897_v22 }
 0x174   : > { %v860_v24 = vpop.f32.mrf.mxu3 }
 0x175   : > { %v1969_v25 = vpop.eup %1968  ;;  %v898_v26 = vadd.f32 %v1959_v12, %v860_v24 }
 0x176   : > { %991 = vmatmul.f32.gmra.mxu0 %v1969_v25  ;;  %1161 = vmatmul.f32.gmra.mxu3 %v1969_v25  ;;  %v1388_v25 = vld [vmem:[%s2791_s13 + $0x70] sm:$0xff] }
 0x177   : > { %1970 = vtanh.f32 %v898_v26  ;;  %v1387_v26 = vld [vmem:[%s2791_s13 + $0x68] sm:$0xff] }
 0x17c   : > { %v886_v27 = vpop.f32.mrf.mxu2  ;;  %v951_v35 = vpop.f32.mrf.mxu3 }
 0x17d   : > { %v1971_v29 = vpop.eup %1970  ;;  %v899_v30 = vadd.f32 %v1959_v12, %v886_v27  ;;  %v1386_v27 = vld [vmem:[%s2791_s13 + $0x60] sm:$0xff] }
 0x17e   : > { %994 = vmatmul.f32.gmra.mxu0 %v1971_v29  ;;  %1164 = vmatmul.f32.gmra.mxu3 %v1971_v29  ;;  %v1385_v29 = vld [vmem:[%s2791_s13 + $0x58] sm:$0xff] }
 0x17f   : > { %1972 = vtanh.f32 %v899_v30  ;;  %v1384_v30 = vld [vmem:[%s2791_s13 + $0x50] sm:$0xff] }
 0x184   : > { %v889_v31 = vpop.f32.mrf.mxu2  ;;  %v954_v36 = vpop.f32.mrf.mxu3 }
 0x185   : > { %v1973_v32 = vpop.eup %1972  ;;  %v900_v33 = vadd.f32 %v1959_v12, %v889_v31  ;;  %v1383_v31 = vld [vmem:[%s2791_s13 + $0x48] sm:$0xff] }
 0x186   : > { %997 = vmatmul.f32.gmra.mxu0 %v1973_v32  ;;  %1167 = vmatmul.f32.gmra.mxu3 %v1973_v32  ;;  %v1382_v32 = vld [vmem:[%s2791_s13 + $0x40] sm:$0xff] }
 0x187   : > { %1974 = vtanh.f32 %v900_v33 }
 0x18c   : > { %v957_v41 = vpop.f32.mrf.mxu3 }
 0x18d   : > { %v1975_v34 = vpop.eup %1974 }
 0x18e   : > { %1000 = vmatmul.f32.gmra.mxu0 %v1975_v34  ;;  %1170 = vmatmul.f32.gmra.mxu3 %v1975_v34  ;;  %v1381_v34 = vld [vmem:[%s2791_s13 + $0x38] sm:$0xff] }
 0x194   : > { %v960_v44 = vpop.f32.mrf.mxu3 }
 0x19c   : > { %v963_v49 = vpop.f32.mrf.mxu3 }
 0x1a4   : > { %v966_v55 = vpop.f32.mrf.mxu3 }
 0x1e3   : > { %v986_v37 = vpop.f32.mrf.mxu0 }
 0x1e4   : > { %v987_v42 = vadd.f32 %v986_v37, %v951_v35  ;;  %v1379_v37 = vld [vmem:[%s2791_s13 + $0x28] sm:$0xff] }
 0x1e9   : > { %v1156_v33 = vpop.f32.mrf.mxu3 }
 0x1eb   : > { %v989_v38 = vpop.f32.mrf.mxu0 }
 0x1ec   : > { %v990_v40 = vadd.f32 %v989_v38, %v954_v36  ;;  %v1380_v36 = vld [vmem:[%s2791_s13 + $0x30] sm:$0xff]  ;;  %v1378_v38 = vld [vmem:[%s2791_s13 + $0x20] sm:$0xff] }
 0x1ee   : > { %1018 = vmatpush.msra.mxu2 %v990_v40  ;;  %v1377_v40 = vld [vmem:[%s2791_s13 + $0x18] sm:$0xff] }
 0x1f0   : > { %1019 = vmatpush.msra.mxu2 %v987_v42  ;;  %v1376_v42 = vld [vmem:[%s2791_s13 + $0x10] sm:$0xff] }
 0x1f1   : > { %1835 = vmatmul.msk.f32.vlgmr.msra.gmra.mxu2 %vm804_vm3, %v2483_v20  ;;  %v1135_v20 = vld [vmem:[#allocation6 + $0xe0] sm:$0xff] }
 0x1f3   : > { %v992_v43 = vpop.f32.mrf.mxu0 }
 0x1f4   : > { %v993_v47 = vadd.f32 %v992_v43, %v957_v41  ;;  %v1159_v41 = vpop.f32.mrf.mxu3 }
 0x1f9   : > { %1836 = vmatmul.msk.f32.gmra.mxu2 %vm804_vm3, %v2488_v23  ;;  %v1133_v23 = vld [vmem:[#allocation6 + $0xd0] sm:$0xff] }
 0x1fb   : > { %v995_v45 = vpop.f32.mrf.mxu0 }
 0x1fc   : > { %v996_v46 = vadd.f32 %v995_v45, %v960_v44 }
 0x1fe   : > { %1041 = vmatpush.msrb.mxu1 %v996_v46  ;;  %v2654_v46 = vld [vmem:[%s2790_s12] ss:$0 sm:$0xff] }
 0x200   : > { %1042 = vmatpush.msrb.mxu1 %v993_v47  ;;  %v1375_v47 = vld [vmem:[%s2791_s13 + $0x8] sm:$0xff] }
 0x201   : > { %1837 = vmatmul.msk.f32.vlgmr.msrb.gmra.mxu1 %vm804_vm3, %v2493_v28  ;;  %v1131_v28 = vld [vmem:[#allocation6 + $0xc0] sm:$0xff] }
 0x202   : > { %1174 = vmatpush.msra.mxu1 %v1138_v48 }
 0x203   : > { %v998_v52 = vpop.f32.mrf.mxu0 }
 0x204   : > { %1175 = vmatpush.msra.mxu1 %v1137_v50  ;;  %v999_v59 = vadd.f32 %v998_v52, %v963_v49  ;;  %v1374_v49 = vld [vmem:[%s2791_s13] sm:$0xff] }
 0x206   : > { %1176 = vmatpush.msra.mxu1 %v1136_v53 }
 0x208   : > { %1177 = vmatpush.msra.mxu1 %v1135_v20  ;;  %v1162_v20 = vpop.f32.mrf.mxu3 }
 0x209   : > { %1838 = vmatmul.msk.f32.gmra.mxu1 %vm804_vm3, %v2514_v39  ;;  %v1128_v39 = vld [vmem:[#allocation6 + $0xa8] sm:$0xff] }
 0x20a   : > { %1178 = vmatpush.msra.mxu1 %v1134_v54 }
 0x20b   : > { %v1001_v56 = vpop.f32.mrf.mxu0 }
 0x20c   : > { %v1002_v58 = vadd.f32 %v1001_v56, %v966_v55  ;;  %1179 = vmatpush.msra.mxu1 %v1133_v23 }
 0x20e   : > { %1064 = vmatpush.msrb.mxu2 %v1002_v58  ;;  %1180 = vmatpush.msra.mxu1 %v1132_v57 }
 0x210   : > { %1065 = vmatpush.msrb.mxu2 %v999_v59  ;;  %1181 = vmatpush.msra.mxu1 %v1131_v28 }
 0x211   : > { %1839 = vmatmul.msk.f32.vlgmr.msrb.gmra.mxu2 %vm804_vm3, %v2528_v51  ;;  %v1123_v51 = vld [vmem:[#allocation6 + $0x80] sm:$0xff] }
 0x212   : > { %1182 = vmatpush.msra.mxu1 %v1130_v61  ;;  %1224 = vmatpush.msra.mxu2 %v1094_v2 }
 0x214   : > { %1183 = vmatpush.msra.mxu1 %v1129_v62  ;;  %v1165_v62 = vpop.f32.mrf.mxu3 }
 0x216   : > { %1184 = vmatpush.msra.mxu1 %v1128_v39 }
 0x218   : > { %1185 = vmatpush.msra.mxu1 %v1127_v63 }
 0x219   : > { %1840 = vmatmul.msk.f32.gmra.mxu2 %vm804_vm3, %v2547_v60  ;;  %v1960_v60 = vld [vmem:[%s2787_s9] ss:$0 sm:$0xff] }
 0x21a   : > { %1186 = vmatpush.msra.mxu1 %v1126_v0 }
 0x21c   : > { %1187 = vmatpush.msra.mxu1 %v1125_v1 }
 0x21e   : > { %1188 = vmatpush.msra.mxu1 %v1124_v4 }
 0x220   : > { %1189 = vmatpush.msra.mxu1 %v1123_v51 }
 0x221   : > { %1841 = vmatmul.msk.f32.vlgmr.msra.gmra.mxu2 %vm750_vm2, %v2436_v3 }
 0x229   : > { %1842 = vmatmul.msk.f32.gmra.mxu2 %vm750_vm2, %v2444_v5 }
 0x231   : > { %1843 = vmatmul.msk.f32.gmra.mxu2 %vm750_vm2, %v2452_v7 }
 0x239   : > { %1844 = vmatmul.msk.f32.gmra.mxu2 %vm750_vm2, %v2460_v9 }
 0x241   : > { %1845 = vmatmul.msk.f32.gmra.mxu2 %vm750_vm2, %v2468_v11 }
 0x249   : > { %1846 = vmatmul.msk.f32.gmra.mxu2 %vm750_vm2, %v2476_v13  ;;  %v1389_v13 = vld [vmem:[%s2791_s13 + $0x78] sm:$0xff] }
 0x24a   : > { %1394 = vmatpush.msra.mxu0 %v1389_v13 }
 0x24c   : > { %1395 = vmatpush.msra.mxu0 %v1388_v25 }
 0x24e   : > { %1396 = vmatpush.msra.mxu0 %v1387_v26 }
 0x250   : > { %1397 = vmatpush.msra.mxu0 %v1386_v27 }
 0x252   : > { %1398 = vmatpush.msra.mxu0 %v1385_v29 }
 0x254   : > { %1399 = vmatpush.msra.mxu0 %v1384_v30 }
 0x256   : > { %1400 = vmatpush.msra.mxu0 %v1383_v31 }
 0x258   : > { %1401 = vmatpush.msra.mxu0 %v1382_v32 }
 0x25a   : > { %1402 = vmatpush.msra.mxu0 %v1381_v34 }
 0x25c   : > { %1403 = vmatpush.msra.mxu0 %v1380_v36 }
 0x25e   : > { %1404 = vmatpush.msra.mxu0 %v1379_v37 }
 0x260   : > { %1405 = vmatpush.msra.mxu0 %v1378_v38 }
 0x262   : > { %1406 = vmatpush.msra.mxu0 %v1377_v40 }
 0x264   : > { %1407 = vmatpush.msra.mxu0 %v1376_v42 }
 0x266   : > { %1408 = vmatpush.msra.mxu0 %v1375_v47 }
 0x268   : > { %1409 = vmatpush.msra.mxu0 %v1374_v49 }
 0x274   : > { %v1021_v6 = vpop.f32.mrf.mxu2 }
 0x275   : > { %v1076_v8 = vadd.f32 %v1960_v60, %v1021_v6 }
 0x277   : > { %1976 = vtanh.f32 %v1076_v8 }
 0x27c   : > { %v1024_v3 = vpop.f32.mrf.mxu2 }
 0x27d   : > { %v1977_v10 = vpop.eup %1976  ;;  %v1077_v12 = vadd.f32 %v1960_v60, %v1024_v3 }
 0x27e   : > { %1190 = vmatmul.f32.vlgmr.msra.gmra.mxu1 %v1977_v10  ;;  %v1044_v5 = vpop.f32.mrf.mxu1 }
 0x27f   : > { %1978 = vtanh.f32 %v1077_v12  ;;  %v1078_v7 = vadd.f32 %v1960_v60, %v1044_v5 }
 0x281   : > { %1980 = vtanh.f32 %v1078_v7  ;;  %v1168_v7 = vpop.f32.mrf.mxu3 }
 0x285   : > { %v1979_v14 = vpop.eup %1978 }
 0x286   : > { %1193 = vmatmul.f32.gmra.mxu1 %v1979_v14  ;;  %v1047_v9 = vpop.f32.mrf.mxu1 }
 0x287   : > { %v1079_v15 = vadd.f32 %v1960_v60, %v1047_v9  ;;  %v1981_v16 = vpop.eup %1980 }
 0x289   : > { %1982 = vtanh.f32 %v1079_v15  ;;  %v1171_v36 = vpop.f32.mrf.mxu3 }
 0x28e   : > { %1196 = vmatmul.f32.gmra.mxu1 %v1981_v16 }
 0x28f   : > { %v1983_v17 = vpop.eup %1982 }
 0x294   : > { %v1067_v11 = vpop.f32.mrf.mxu2 }
 0x295   : > { %v1080_v18 = vadd.f32 %v1960_v60, %v1067_v11 }
 0x296   : > { %1199 = vmatmul.f32.gmra.mxu1 %v1983_v17 }
 0x297   : > { %1984 = vtanh.f32 %v1080_v18 }
 0x29c   : > { %v1070_v19 = vpop.f32.mrf.mxu2 }
 0x29d   : > { %v1985_v21 = vpop.eup %1984  ;;  %v1081_v22 = vadd.f32 %v1960_v60, %v1070_v19 }
 0x29e   : > { %1202 = vmatmul.f32.gmra.mxu1 %v1985_v21 }
 0x29f   : > { %1986 = vtanh.f32 %v1081_v22 }
 0x2a4   : > { %v1226_v35 = vpop.f32.mrf.mxu2 }
 0x2a5   : > { %v1987_v24 = vpop.eup %1986 }
 0x2a6   : > { %1205 = vmatmul.f32.gmra.mxu1 %v1987_v24 }
 0x2ac   : > { %v1229_v44 = vpop.f32.mrf.mxu2 }
 0x2b4   : > { %v1232_v23 = vpop.f32.mrf.mxu2 }
 0x2bc   : > { %v1235_v63 = vpop.f32.mrf.mxu2 }
 0x2c4   : > { %v1238_v15 = vpop.f32.mrf.mxu2 }
 0x2fb   : > { %v1191_v43 = vpop.f32.mrf.mxu1 }
 0x2fc   : > { %v1192_v45 = vadd.f32 %v1191_v43, %v1156_v33  ;;  %v1241_v43 = vpop.f32.mrf.mxu2 }
 0x2fe   : > { %v1227_v48 = vadd.f32 %v1226_v35, %v1192_v45 }
 0x300   : > { %v1248_v50 = vadd.f32 %v2654_v46, %v1227_v48 }
 0x302   : > { %v1847_v52 = vmul.f32 -1.442695, %v1248_v50 }
 0x303   : > { %v1194_v53 = vpop.f32.mrf.mxu1 }
 0x304   : > { %1988 = vpow2.f32 %v1847_v52  ;;  %v1195_v54 = vadd.f32 %v1194_v53, %v1159_v41 }
 0x306   : > { %v1230_v55 = vadd.f32 %v1229_v44, %v1195_v54 }
 0x308   : > { %v2664_v56 = vadd.f32 %v2654_v46, %v1230_v55 }
 0x30a   : > { %v1989_v57 = vpop.eup %1988  ;;  %v1848_v58 = vmul.f32 -1.442695, %v2664_v56 }
 0x30b   : > { %v1272_v28 = vadd.f32 1.0, %v1989_v57  ;;  %v1197_v59 = vpop.f32.mrf.mxu1 }
 0x30c   : > { %1990 = vpow2.f32 %v1848_v58  ;;  %v1198_v61 = vadd.f32 %v1197_v59, %v1162_v20 }
 0x30d   : > { %1992 = vrcp.f32 %v1272_v28  ;;  %v1287_v12 = vand.u32 2147483647, %v1272_v28  ;;  %v1289_v5 = vand.u32 2147483648, %v1272_v28  ;;  %vm1283_vm5 = vweird.f32 %v1272_v28 }
 0x30e   : > { %v1233_v39 = vadd.f32 %v1232_v23, %v1198_v61 }
 0x30f   : > { %vm1288_vm7 = vcmp.eq.f32.partialorder %v1287_v12, 8.507059e+37  ;;  %v1290_v19 = vor.u32 1.1754944e-38, %v1289_v5 }
 0x310   : > { %v2668_v0 = vadd.f32 %v2654_v46, %v1233_v39 }
 0x312   : > { %v1991_v1 = vpop.eup %1990  ;;  %v1849_v2 = vmul.f32 -1.442695, %v2668_v0 }
 0x313   : > { %v1993_v4 = vpop.eup %1992  ;;  %v1273_v51 = vadd.f32 1.0, %v1991_v1  ;;  %v1200_v60 = vpop.f32.mrf.mxu1 }
 0x314   : > { %v1279_v6 = vmul.f32 %v1993_v4, %v1272_v28  ;;  %1994 = vpow2.f32 %v1849_v2  ;;  %v1201_v8 = vadd.f32 %v1200_v60, %v1165_v62  ;;  %vm1284_vm4 = vweird.f32 %v1993_v4 }
 0x315   : > { %1996 = vrcp.f32 %v1273_v51  ;;  %vm1285_vm6 = vmor %vm1283_vm5, %vm1284_vm4  ;;  %v1302_v31 = vand.u32 2147483647, %v1273_v51  ;;  %v1304_v32 = vand.u32 2147483648, %v1273_v51  ;;  %vm1298_vm9 = vweird.f32 %v1273_v51 }
 0x316   : > { %v1280_v3 = vsub.f32 1.0, %v1279_v6  ;;  %v1236_v10 = vadd.f32 %v1235_v63, %v1201_v8 }
 0x317   : > { %vm1303_vm11 = vcmp.eq.f32.partialorder %v1302_v31, 8.507059e+37  ;;  %v1305_v44 = vor.u32 1.1754944e-38, %v1304_v32 }
 0x318   : > { %v1281_v14 = vmul.f32 %v1993_v4, %v1280_v3  ;;  %v2672_v9 = vadd.f32 %v2654_v46, %v1236_v10 }
 0x31a   : > { %v1995_v16 = vpop.eup %1994  ;;  %v1282_v17 = vadd.f32 %v1993_v4, %v1281_v14  ;;  %v1850_v11 = vmul.f32 -1.442695, %v2672_v9 }
 0x31b   : > { %v1997_v18 = vpop.eup %1996  ;;  %v1274_v21 = vadd.f32 1.0, %v1995_v16  ;;  %v1203_v22 = vpop.f32.mrf.mxu1 }
 0x31c   : > { %v1286_v24 = vsel %vm1285_vm6, %v1993_v4, %v1282_v17  ;;  %1998 = vpow2.f32 %v1850_v11  ;;  %v1204_v13 = vadd.f32 %v1203_v22, %v1168_v7  ;;  %v1294_v25 = vmul.f32 %v1997_v18, %v1273_v51 }
 0x31d   : > { %v1291_v26 = vsel %vm1288_vm7, %v1290_v19, %v1286_v24  ;;  %2000 = vrcp.f32 %v1274_v21  ;;  %vm1299_vm8 = vweird.f32 %v1997_v18  ;;  %v1319_v20 = vand.u32 2147483648, %v1274_v21 }
 0x31e   : > { %v1368_v27 = vmul.f32 %v1291_v26, %v1248_v50  ;;  %v1239_v29 = vadd.f32 %v1238_v15, %v1204_v13  ;;  %v1295_v30 = vsub.f32 1.0, %v1294_v25  ;;  %vm1300_vm10 = vmor %vm1298_vm9, %vm1299_vm8  ;;  %v1317_v55 = vand.u32 2147483647, %v1274_v21 }
 0x31f   : > { %vm1313_vm13 = vweird.f32 %v1274_v21  ;;  %v1320_v62 = vor.u32 1.1754944e-38, %v1319_v20 }
 0x320   : > { %v2676_v33 = vadd.f32 %v2654_v46, %v1239_v29  ;;  %1410 = vmatmul.f32.vlgmr.msra.gmra.mxu0 %v1368_v27  ;;  %v1296_v34 = vmul.f32 %v1997_v18, %v1295_v30  ;;  %vm1318_vm15 = vcmp.eq.f32.partialorder %v1317_v55, 8.507059e+37 }
 0x322   : > { %v1999_v35 = vpop.eup %1998  ;;  %v1851_v37 = vmul.f32 -1.442695, %v2676_v33  ;;  %v1297_v38 = vadd.f32 %v1997_v18, %v1296_v34 }
 0x323   : > { %v2001_v40 = vpop.eup %2000  ;;  %v1275_v41 = vadd.f32 1.0, %v1999_v35  ;;  %v1206_v42 = vpop.f32.mrf.mxu1  ;;  %v1564_v35 = vld [vmem:[#allocation8 + $0x78] sm:$0xff] }
 0x324   : > { %2002 = vpow2.f32 %v1851_v37  ;;  %v1207_v45 = vadd.f32 %v1206_v42, %v1171_v36  ;;  %v1301_v47 = vsel %vm1300_vm10, %v1997_v18, %v1297_v38  ;;  %v1309_v48 = vmul.f32 %v2001_v40, %v1274_v21  ;;  %1569 = vmatpush.msrb.mxu2 %v1564_v35  ;;  %1866 = vmatpush.msrb.mxu3 %v1564_v35  ;;  %v1562_v36 = vld [vmem:[#allocation8 + $0x68] sm:$0xff]  ;;  %v1561_v37 = vld [vmem:[#allocation8 + $0x60] sm:$0xff]  ;;  %v1560_v38 = vld [vmem:[#allocation8 + $0x58] sm:$0xff] }
 0x325   : > { %2004 = vrcp.f32 %v1275_v41  ;;  %v1306_v49 = vsel %vm1303_vm11, %v1305_v44, %v1301_v47  ;;  %vm1314_vm12 = vweird.f32 %v2001_v40  ;;  %v1334_v2 = vand.u32 2147483648, %v1275_v41  ;;  %v1557_v42 = vld [vmem:[#allocation8 + $0x40] sm:$0xff]  ;;  %v1555_v44 = vld [vmem:[#allocation8 + $0x30] sm:$0xff] }
 0x326   : > { %v1242_v50 = vadd.f32 %v1241_v43, %v1207_v45  ;;  %v1369_v52 = vmul.f32 %v1306_v49, %v2664_v56  ;;  %v1310_v53 = vsub.f32 1.0, %v1309_v48  ;;  %vm1315_vm14 = vmor %vm1313_vm13, %vm1314_vm12  ;;  %v1332_v51 = vand.u32 2147483647, %v1275_v41  ;;  %v1556_v43 = vld [vmem:[#allocation8 + $0x38] sm:$0xff]  ;;  %v1554_v45 = vld [vmem:[#allocation8 + $0x28] sm:$0xff] }
 0x327   : > { %vm1328_vm1 = vweird.f32 %v1275_v41  ;;  %v1335_v10 = vor.u32 1.1754944e-38, %v1334_v2  ;;  %v1553_v47 = vld [vmem:[#allocation8 + $0x20] sm:$0xff]  ;;  %v1552_v48 = vld [vmem:[#allocation8 + $0x18] sm:$0xff]  ;;  %v2202_v2 = vmov 0  }
 0x328   : > { %v2681_v54 = vadd.f32 %v2654_v46, %v1242_v50  ;;  %1413 = vmatmul.f32.gmra.mxu0 %v1369_v52  ;;  %v1311_v23 = vmul.f32 %v2001_v40, %v1310_v53  ;;  %vm1333_vm3 = vcmp.eq.f32.partialorder %v1332_v51, 8.507059e+37  ;;  %v2691_v49 = vld [vmem:[%s2792_s14] ss:$0 sm:$0xff]  ;;  %v1551_v50 = vld [vmem:[#allocation8 + $0x10] sm:$0xff]  ;;  %v1550_v52 = vld [vmem:[#allocation8 + $0x8] sm:$0xff]  ;;  %1956 = vset.pattern.permute.xlu0 %v2202_v2 }
 0x329   : > { %1957 = vset.pattern.permute.xlu1 %v2202_v2  ;;  %1958 = vset.pattern.permute.xlu2 %v2202_v2 }
 0x32a   : > { %v2003_v57 = vpop.eup %2002  ;;  %v1852_v58 = vmul.f32 -1.442695, %v2681_v54  ;;  %v1312_v28 = vadd.f32 %v2001_v40, %v1311_v23 }
 0x32b   : > { %v2005_v59 = vpop.eup %2004  ;;  %v1276_v61 = vadd.f32 1.0, %v2003_v57 }
 0x32c   : > { %2006 = vpow2.f32 %v1852_v58  ;;  %v1316_v56 = vsel %vm1315_vm14, %v2001_v40, %v1312_v28  ;;  %v1324_v39 = vmul.f32 %v2005_v59, %v1275_v41  ;;  %vm1329_vm0 = vweird.f32 %v2005_v59  ;;  %v1559_v40 = vld [vmem:[#allocation8 + $0x50] sm:$0xff]  ;;  %v1558_v41 = vld [vmem:[#allocation8 + $0x48] sm:$0xff] }
 0x32d   : > { %2008 = vrcp.f32 %v1276_v61  ;;  %v1321_v46 = vsel %vm1318_vm15, %v1320_v62, %v1316_v56  ;;  %vm1330_vm2 = vmor %vm1328_vm1, %vm1329_vm0  ;;  %v1349_v15 = vand.u32 2147483648, %v1276_v61  ;;  %v1347_v17 = vand.u32 2147483647, %v1276_v61 }
 0x32e   : > { %v1370_v63 = vmul.f32 %v1321_v46, %v2668_v0  ;;  %v1325_v1 = vsub.f32 1.0, %v1324_v39  ;;  %vm1343_vm5 = vweird.f32 %v1276_v61 }
 0x32f   : > { %v1350_v19 = vor.u32 1.1754944e-38, %v1349_v15  ;;  %vm1348_vm7 = vcmp.eq.f32.partialorder %v1347_v17, 8.507059e+37 }
 0x330   : > { %1416 = vmatmul.f32.gmra.mxu0 %v1370_v63  ;;  %v1326_v4 = vmul.f32 %v2005_v59, %v1325_v1 }
 0x332   : > { %v2007_v60 = vpop.eup %2006  ;;  %v1327_v6 = vadd.f32 %v2005_v59, %v1326_v4  ;;  %v1604_v4 = vld [vmem:[%s2705_s30] sm:$0xff] }
 0x333   : > { %v2009_v8 = vpop.eup %2008  ;;  %v1277_v3 = vadd.f32 1.0, %v2007_v60  ;;  %1612 = vperm.xlu0 %1956, %v1604_v4  }
 0x334   : > { %v1331_v12 = vsel %vm1330_vm2, %v2005_v59, %v1327_v6  ;;  %v1339_v5 = vmul.f32 %v2009_v8, %v1276_v61  ;;  %vm1344_vm4 = vweird.f32 %v2009_v8 }
 0x335   : > { %2010 = vrcp.f32 %v1277_v3  ;;  %v1336_v7 = vsel %vm1333_vm3, %v1335_v10, %v1331_v12  ;;  %vm1345_vm6 = vmor %vm1343_vm5, %vm1344_vm4  ;;  %v1364_v26 = vand.u32 2147483648, %v1277_v3  ;;  %v1362_v27 = vand.u32 2147483647, %v1277_v3 }
 0x336   : > { %v1371_v0 = vmul.f32 %v1336_v7, %v2672_v9  ;;  %v1340_v14 = vsub.f32 1.0, %v1339_v5  ;;  %vm1358_vm9 = vweird.f32 %v1277_v3 }
 0x337   : > { %v1365_v30 = vor.u32 1.1754944e-38, %v1364_v26  ;;  %vm1363_vm11 = vcmp.eq.f32.partialorder %v1362_v27, 8.507059e+37  ;;  %v1606_v26 = vld [vmem:[%s2705_s30 + $0x10] sm:$0xff] }
 0x338   : > { %1419 = vmatmul.f32.gmra.mxu0 %v1371_v0  ;;  %v1341_v16 = vmul.f32 %v2009_v8, %v1340_v14  ;;  %v1605_v0 = vld [vmem:[%s2705_s30 + $0x8] sm:$0xff]  ;;  %1622 = vperm.xlu1 %1957, %v1606_v26  }
 0x33a   : > { %v1342_v11 = vadd.f32 %v2009_v8, %v1341_v16 }
 0x33b   : > { %v2011_v18 = vpop.eup %2010  ;;  %1617 = vperm.xlu0 %1956, %v1605_v0  }
 0x33c   : > { %v1346_v21 = vsel %vm1345_vm6, %v2009_v8, %v1342_v11  ;;  %v1354_v22 = vmul.f32 %v2011_v18, %v1277_v3  ;;  %vm1359_vm8 = vweird.f32 %v2011_v18 }
 0x33d   : > { %v1351_v24 = vsel %vm1348_vm7, %v1350_v19, %v1346_v21  ;;  %vm1360_vm10 = vmor %vm1358_vm9, %vm1359_vm8 }
 0x33e   : > { %v1372_v13 = vmul.f32 %v1351_v24, %v2676_v33  ;;  %v1355_v25 = vsub.f32 1.0, %v1354_v22  ;;  %v1563_v33 = vld [vmem:[#allocation8 + $0x70] sm:$0xff] }
 0x33f   : > { %1570 = vmatpush.msrb.mxu2 %v1563_v33  ;;  %1867 = vmatpush.msrb.mxu3 %v1563_v33 }
 0x340   : > { %1422 = vmatmul.f32.gmra.mxu0 %v1372_v13  ;;  %v1356_v9 = vmul.f32 %v2011_v18, %v1355_v25 }
 0x341   : > { %1571 = vmatpush.msrb.mxu2 %v1562_v36  ;;  %1868 = vmatpush.msrb.mxu3 %v1562_v36 }
 0x342   : > { %v1357_v29 = vadd.f32 %v2011_v18, %v1356_v9 }
 0x343   : > { %1572 = vmatpush.msrb.mxu2 %v1561_v37  ;;  %1869 = vmatpush.msrb.mxu3 %v1561_v37 }
 0x344   : > { %v1361_v31 = vsel %vm1360_vm10, %v2011_v18, %v1357_v29 }
 0x345   : > { %v1366_v32 = vsel %vm1363_vm11, %v1365_v30, %v1361_v31  ;;  %1573 = vmatpush.msrb.mxu2 %v1560_v38  ;;  %1870 = vmatpush.msrb.mxu3 %v1560_v38 }
 0x346   : > { %v1373_v34 = vmul.f32 %v1366_v32, %v2681_v54  ;;  %v1549_v54 = vld [vmem:[#allocation8] sm:$0xff] }
 0x347   : > { %1574 = vmatpush.msrb.mxu2 %v1559_v40  ;;  %1871 = vmatpush.msrb.mxu3 %v1559_v40 }
 0x348   : > { %1425 = vmatmul.f32.gmra.mxu0 %v1373_v34 }
 0x349   : > { %1575 = vmatpush.msrb.mxu2 %v1558_v41  ;;  %1872 = vmatpush.msrb.mxu3 %v1558_v41 }
 0x34b   : > { %1576 = vmatpush.msrb.mxu2 %v1557_v42  ;;  %1873 = vmatpush.msrb.mxu3 %v1557_v42 }
 0x34d   : > { %1577 = vmatpush.msrb.mxu2 %v1556_v43  ;;  %1874 = vmatpush.msrb.mxu3 %v1556_v43 }
 0x34f   : > { %1578 = vmatpush.msrb.mxu2 %v1555_v44  ;;  %1875 = vmatpush.msrb.mxu3 %v1555_v44 }
 0x351   : > { %1579 = vmatpush.msrb.mxu2 %v1554_v45  ;;  %1876 = vmatpush.msrb.mxu3 %v1554_v45  ;;  %v1607_v45 = vld [vmem:[%s2705_s30 + $0x18] sm:$0xff] }
 0x352   : > { %1627 = vperm.xlu1 %1957, %v1607_v45  }
 0x353   : > { %1580 = vmatpush.msrb.mxu2 %v1553_v47  ;;  %1877 = vmatpush.msrb.mxu3 %v1553_v47  ;;  %v1608_v47 = vld [vmem:[%s2705_s30 + $0x20] sm:$0xff] }
 0x354   : > { %1632 = vperm.xlu2 %1958, %v1608_v47  }
 0x355   : > { %1581 = vmatpush.msrb.mxu2 %v1552_v48  ;;  %1878 = vmatpush.msrb.mxu3 %v1552_v48 }
 0x357   : > { %1582 = vmatpush.msrb.mxu2 %v1551_v50  ;;  %1879 = vmatpush.msrb.mxu3 %v1551_v50 }
 0x359   : > { %1583 = vmatpush.msrb.mxu2 %v1550_v52  ;;  %1880 = vmatpush.msrb.mxu3 %v1550_v52 }
 0x35b   : > { %1584 = vmatpush.msrb.mxu2 %v1549_v54  ;;  %1881 = vmatpush.msrb.mxu3 %v1549_v54 }
 0x39d   : > { %v1411_v53 = vpop.f32.mrf.mxu0 }
 0x39e   : > { %v1412_v20 = vadd.f32 %v2691_v49, %v1411_v53 }
 0x3a0   : > { %v1853_v23 = vmul.f32 -1.442695, %v1412_v20 }
 0x3a2   : > { %2012 = vpow2.f32 %v1853_v23 }
 0x3a5   : > { %v1414_v55 = vpop.f32.mrf.mxu0 }
 0x3a6   : > { %v2695_v57 = vadd.f32 %v2691_v49, %v1414_v55 }
 0x3a8   : > { %v2013_v58 = vpop.eup %2012  ;;  %v1854_v28 = vmul.f32 -1.442695, %v2695_v57 }
 0x3a9   : > { %v1447_v59 = vadd.f32 1.0, %v2013_v58 }
 0x3aa   : > { %2014 = vpow2.f32 %v1854_v28 }
 0x3ab   : > { %2016 = vrcp.f32 %v1447_v59  ;;  %v1464_v60 = vand.u32 2147483648, %v1447_v59  ;;  %v1462_v3 = vand.u32 2147483647, %v1447_v59  ;;  %vm1458_vm13 = vweird.f32 %v1447_v59 }
 0x3ad   : > { %v1417_v61 = vpop.f32.mrf.mxu0  ;;  %v1465_v15 = vor.u32 1.1754944e-38, %v1464_v60  ;;  %vm1463_vm15 = vcmp.eq.f32.partialorder %v1462_v3, 8.507059e+37 }
 0x3ae   : > { %v2699_v62 = vadd.f32 %v2691_v49, %v1417_v61  ;;  %v1633_v45 = vpop.permute.xlu2 %1632 }
 0x3b0   : > { %v2015_v56 = vpop.eup %2014  ;;  %v1855_v39 = vmul.f32 -1.442695, %v2699_v62 }
 0x3b1   : > { %v2017_v46 = vpop.eup %2016  ;;  %v1448_v63 = vadd.f32 1.0, %v2015_v56 }
 0x3b2   : > { %v1454_v1 = vmul.f32 %v2017_v46, %v1447_v59  ;;  %2018 = vpow2.f32 %v1855_v39  ;;  %vm1459_vm12 = vweird.f32 %v2017_v46  ;;  %v1609_v59 = vld [vmem:[%s2705_s30 + $0x28] sm:$0xff] }
 0x3b3   : > { %2020 = vrcp.f32 %v1448_v63  ;;  %vm1460_vm14 = vmor %vm1458_vm13, %vm1459_vm12  ;;  %v1479_v25 = vand.u32 2147483648, %v1448_v63  ;;  %v1477_v9 = vand.u32 2147483647, %v1448_v63  ;;  %vm1473_vm1 = vweird.f32 %v1448_v63  ;;  %1637 = vperm.xlu2 %1958, %v1609_v59  }
 0x3b4   : > { %v1455_v51 = vsub.f32 1.0, %v1454_v1 }
 0x3b5   : > { %v1420_v6 = vpop.f32.mrf.mxu0  ;;  %v1480_v35 = vor.u32 1.1754944e-38, %v1479_v25  ;;  %vm1478_vm3 = vcmp.eq.f32.partialorder %v1477_v9, 8.507059e+37  ;;  %v1613_v9 = vpop.permute.xlu0 %1612 }
 0x3b6   : > { %v1456_v8 = vmul.f32 %v2017_v46, %v1455_v51  ;;  %v2710_v10 = vadd.f32 %v2691_v49, %v1420_v6 }
 0x3b8   : > { %v2019_v12 = vpop.eup %2018  ;;  %v1457_v5 = vadd.f32 %v2017_v46, %v1456_v8  ;;  %v1856_v7 = vmul.f32 -1.442695, %v2710_v10 }
 0x3b9   : > { %v2021_v14 = vpop.eup %2020  ;;  %v1449_v16 = vadd.f32 1.0, %v2019_v12 }
 0x3ba   : > { %v1461_v17 = vsel %vm1460_vm14, %v2017_v46, %v1457_v5  ;;  %2022 = vpow2.f32 %v1856_v7  ;;  %v1469_v11 = vmul.f32 %v2021_v14, %v1448_v63  ;;  %vm1474_vm0 = vweird.f32 %v2021_v14 }
 0x3bb   : > { %v1466_v18 = vsel %vm1463_vm15, %v1465_v15, %v1461_v17  ;;  %2024 = vrcp.f32 %v1449_v16  ;;  %vm1475_vm2 = vmor %vm1473_vm1, %vm1474_vm0  ;;  %v1494_v41 = vand.u32 2147483648, %v1449_v16  ;;  %v1492_v44 = vand.u32 2147483647, %v1449_v16 }
 0x3bc   : > { %v1543_v19 = vmul.f32 %v1466_v18, %v1412_v20  ;;  %v1470_v21 = vsub.f32 1.0, %v1469_v11  ;;  %vm1488_vm5 = vweird.f32 %v1449_v16 }
 0x3bd   : > { %v1423_v22 = vpop.f32.mrf.mxu0  ;;  %v1495_v54 = vor.u32 1.1754944e-38, %v1494_v41  ;;  %vm1493_vm7 = vcmp.eq.f32.partialorder %v1492_v44, 8.507059e+37 }
 0x3be   : > { %v2715_v24 = vadd.f32 %v2691_v49, %v1423_v22  ;;  %1585 = vmatmul.f32.vlgmr.msrb.gmra.mxu2 %v1543_v19  ;;  %v1471_v13 = vmul.f32 %v2021_v14, %v1470_v21 }
 0x3c0   : > { %v2023_v27 = vpop.eup %2022  ;;  %v1857_v29 = vmul.f32 -1.442695, %v2715_v24  ;;  %v1472_v30 = vadd.f32 %v2021_v14, %v1471_v13 }
 0x3c1   : > { %v2025_v31 = vpop.eup %2024  ;;  %v1450_v32 = vadd.f32 1.0, %v2023_v27 }
 0x3c2   : > { %2026 = vpow2.f32 %v1857_v29  ;;  %v1476_v34 = vsel %vm1475_vm2, %v2021_v14, %v1472_v30  ;;  %v1484_v33 = vmul.f32 %v2025_v31, %v1449_v16  ;;  %vm1489_vm4 = vweird.f32 %v2025_v31 }
 0x3c3   : > { %2028 = vrcp.f32 %v1450_v32  ;;  %v1481_v36 = vsel %vm1478_vm3, %v1480_v35, %v1476_v34  ;;  %vm1490_vm6 = vmor %vm1488_vm5, %vm1489_vm4  ;;  %v1509_v28 = vand.u32 2147483648, %v1450_v32  ;;  %v1507_v56 = vand.u32 2147483647, %v1450_v32 }
 0x3c4   : > { %v1485_v37 = vsub.f32 1.0, %v1484_v33  ;;  %v1544_v40 = vmul.f32 %v1481_v36, %v2695_v57  ;;  %vm1503_vm9 = vweird.f32 %v1450_v32  ;;  %v1623_v33 = vpop.permute.xlu1 %1622 }
 0x3c5   : > { %v1426_v38 = vpop.f32.mrf.mxu0  ;;  %v1510_v1 = vor.u32 1.1754944e-38, %v1509_v28  ;;  %vm1508_vm11 = vcmp.eq.f32.partialorder %v1507_v56, 8.507059e+37 }
 0x3c6   : > { %v2721_v42 = vadd.f32 %v2691_v49, %v1426_v38  ;;  %v1486_v43 = vmul.f32 %v2025_v31, %v1485_v37  ;;  %1588 = vmatmul.f32.gmra.mxu2 %v1544_v40 }
 0x3c8   : > { %v2027_v48 = vpop.eup %2026  ;;  %v1858_v50 = vmul.f32 -1.442695, %v2721_v42  ;;  %v1487_v52 = vadd.f32 %v2025_v31, %v1486_v43 }
 0x3c9   : > { %v2029_v53 = vpop.eup %2028  ;;  %v1451_v20 = vadd.f32 1.0, %v2027_v48 }
 0x3ca   : > { %v1499_v49 = vmul.f32 %v2029_v53, %v1450_v32  ;;  %2030 = vpow2.f32 %v1858_v50  ;;  %v1491_v23 = vsel %vm1490_vm6, %v2025_v31, %v1487_v52  ;;  %vm1504_vm8 = vweird.f32 %v2029_v53  ;;  %v1618_v32 = vpop.permute.xlu0 %1617 }
 0x3cb   : > { %2032 = vrcp.f32 %v1451_v20  ;;  %v1496_v55 = vsel %vm1493_vm7, %v1495_v54, %v1491_v23  ;;  %vm1505_vm10 = vmor %vm1503_vm9, %vm1504_vm8  ;;  %v1524_v8 = vand.u32 2147483648, %v1451_v20  ;;  %v1522_v12 = vand.u32 2147483647, %v1451_v20 }
 0x3cc   : > { %v1500_v57 = vsub.f32 1.0, %v1499_v49  ;;  %v1545_v58 = vmul.f32 %v1496_v55, %v2699_v62  ;;  %vm1518_vm13 = vweird.f32 %v1451_v20  ;;  %v1628_v41 = vpop.permute.xlu1 %1627 }
 0x3cd   : > { %v1525_v0 = vor.u32 1.1754944e-38, %v1524_v8  ;;  %vm1523_vm15 = vcmp.eq.f32.partialorder %v1522_v12, 8.507059e+37 }
 0x3ce   : > { %v1501_v61 = vmul.f32 %v2029_v53, %v1500_v57  ;;  %1591 = vmatmul.f32.gmra.mxu2 %v1545_v58 }
 0x3d0   : > { %v2031_v39 = vpop.eup %2030  ;;  %v1502_v46 = vadd.f32 %v2029_v53, %v1501_v61 }
 0x3d1   : > { %v2033_v63 = vpop.eup %2032  ;;  %v1452_v2 = vadd.f32 1.0, %v2031_v39 }
 0x3d2   : > { %v1506_v4 = vsel %vm1505_vm10, %v2029_v53, %v1502_v46  ;;  %v1514_v51 = vmul.f32 %v2033_v63, %v1451_v20  ;;  %vm1519_vm12 = vweird.f32 %v2033_v63 }
 0x3d3   : > { %v1511_v60 = vsel %vm1508_vm11, %v1510_v1, %v1506_v4  ;;  %2034 = vrcp.f32 %v1452_v2  ;;  %vm1520_vm14 = vmor %vm1518_vm13, %vm1519_vm12  ;;  %v1539_v18 = vand.u32 2147483648, %v1452_v2  ;;  %v1537_v19 = vand.u32 2147483647, %v1452_v2 }
 0x3d4   : > { %v1546_v62 = vmul.f32 %v1511_v60, %v2710_v10  ;;  %v1515_v6 = vsub.f32 1.0, %v1514_v51  ;;  %vm1533_vm1 = vweird.f32 %v1452_v2 }
 0x3d5   : > { %v1540_v22 = vor.u32 1.1754944e-38, %v1539_v18  ;;  %vm1538_vm3 = vcmp.eq.f32.partialorder %v1537_v19, 8.507059e+37 }
 0x3d6   : > { %1594 = vmatmul.f32.vlgmr.msrb.gmra.mxu3 %v1546_v62  ;;  %v1516_v3 = vmul.f32 %v2033_v63, %v1515_v6 }
 0x3d8   : > { %v1517_v5 = vadd.f32 %v2033_v63, %v1516_v3 }
 0x3d9   : > { %v2035_v7 = vpop.eup %2034 }
 0x3da   : > { %v1521_v14 = vsel %vm1520_vm14, %v2033_v63, %v1517_v5  ;;  %v1529_v15 = vmul.f32 %v2035_v7, %v1452_v2  ;;  %vm1534_vm0 = vweird.f32 %v2035_v7 }
 0x3db   : > { %v1526_v16 = vsel %vm1523_vm15, %v1525_v0, %v1521_v14  ;;  %vm1535_vm2 = vmor %vm1533_vm1, %vm1534_vm0 }
 0x3dc   : > { %v1547_v17 = vmul.f32 %v1526_v16, %v2715_v24  ;;  %v1530_v11 = vsub.f32 1.0, %v1529_v15  ;;  %v1963_v24 = vld [vmem:[%s2834_s17] ss:$0 sm:$0xff] }
 0x3de   : > { %1597 = vmatmul.f32.gmra.mxu3 %v1547_v17  ;;  %v1531_v10 = vmul.f32 %v2035_v7, %v1530_v11 }
 0x3e0   : > { %v1532_v21 = vadd.f32 %v2035_v7, %v1531_v10 }
 0x3e2   : > { %v1536_v13 = vsel %vm1535_vm2, %v2035_v7, %v1532_v21 }
 0x3e3   : > { %v1541_v25 = vsel %vm1538_vm3, %v1540_v22, %v1536_v13 }
 0x3e4   : > { %v1548_v26 = vmul.f32 %v1541_v25, %v2721_v42 }
 0x3e6   : > { %1600 = vmatmul.f32.gmra.mxu3 %v1548_v26 }
 0x40d   : > { %v1638_v53 = vpop.permute.xlu2 %1637 }
 0x441   : > { %v1586_v27 = vpop.f32.mrf.mxu2 }
 0x442   : > { %v1587_v29 = vadd.f32 %v1963_v24, %v1586_v27 }
 0x444   : > { %v1640_v30 = vmul.f32 %v1613_v9, %v1587_v29 }
 0x446   : > { %1646 = vst [vmem:[%s2736_s23] sm:$0xff] %v1640_v30 }
 0x449   : > { %v1589_v31 = vpop.f32.mrf.mxu2 }
 0x44a   : > { %v1590_v34 = vadd.f32 %v1963_v24, %v1589_v31 }
 0x44c   : > { %v1641_v35 = vmul.f32 %v1618_v32, %v1590_v34 }
 0x44e   : > { %1647 = vst [vmem:[%s2736_s23 + $0x8] sm:$0xff] %v1641_v35 }
 0x451   : > { %v1592_v36 = vpop.f32.mrf.mxu2 }
 0x452   : > { %v1593_v37 = vadd.f32 %v1963_v24, %v1592_v36 }
 0x454   : > { %v1642_v38 = vmul.f32 %v1623_v33, %v1593_v37 }
 0x456   : > { %1648 = vst [vmem:[%s2736_s23 + $0x10] sm:$0xff] %v1642_v38 }
 0x459   : > { %v1595_v40 = vpop.f32.mrf.mxu3 }
 0x45a   : > { %v1596_v42 = vadd.f32 %v1963_v24, %v1595_v40 }
 0x45c   : > { %v1643_v43 = vmul.f32 %v1628_v41, %v1596_v42 }
 0x45e   : > { %1649 = vst [vmem:[%s2736_s23 + $0x18] sm:$0xff] %v1643_v43 }
 0x461   : > { %v1598_v44 = vpop.f32.mrf.mxu3 }
 0x462   : > { %v1599_v47 = vadd.f32 %v1963_v24, %v1598_v44 }
 0x464   : > { %v1644_v48 = vmul.f32 %v1633_v45, %v1599_v47 }
 0x466   : > { %1650 = vst [vmem:[%s2736_s23 + $0x20] sm:$0xff] %v1644_v48 }
 0x469   : > { %v1601_v50 = vpop.f32.mrf.mxu3 }
 0x46a   : > { %v1602_v52 = vadd.f32 %v1963_v24, %v1601_v50 }
 0x46c   : > { %v1645_v20 = vmul.f32 %v1638_v53, %v1602_v52 }
 0x46e   : > { %1651 = vst [vmem:[%s2736_s23 + $0x28] sm:$0xff] %v1645_v20 }
 0x46f   : > { %2153 = shalt.err (!%p2150_p12)
}
 0x470   : > { %s2203_s24 = smov 128   ;;  %s2204_s23 = smov 8  }
 0x471   : > { %1894 = dma.vmem_to_hbm [thread:$0]  (%p2367_p3), %s1666_s21, 768, %s1668_s18, %s1653_s29, %s2203_s24, %s2203_s24, %s2204_s23  }
 0x472 PF: > { %s2837_s26 = sld [smem:[#allocation13_spill]] }
 0x473   : > { %s2839_s3 = sld [smem:[#allocation15_spill]] }
 0x478   : > { %s1682_s22 = sand.u32 1, %s2837_s26  }
 0x479   : > { %p2840_p13 = scmp.ge.s32.totalorder %s2839_s3, 2  ;;  %s1683_s19 = scalar_lea.sflag [#allocation5], %s1682_s22 }
 0x47b   : > { %p1908_p0 = pnand %p2840_p13, %p2330_p6 }
 0x47d   : > { %p1909_p5 = pneg %p1908_p0 }
 0x47f   : > { %2179 = dma.done.wait (%p1909_p5), %s1683_s19, 768  }
 0x480   : > { %2181 = vsyncadd (%p1909_p5), %s1683_s19, 4294966528  ;;  %s2841_s27 = sld [smem:[#allocation17_spill]]  ;;  %s2844_s24 = smov %s2188_s25 }
 0x481   : > { %s2842_s11 = sld [smem:[#allocation14_spill]] }
 0x482   : > { %s2843_s26 = sld [smem:[#allocation19_spill]] }
 0x486   : > { %p31_p7 = scmp.ge.s32.totalorder %s2841_s27, 4  }
 0x487   : > { %s2845_s25 = smov %s2842_s11 }
 0x488   :  { %33 = sbr.rel (!%p31_p7) target bundleno = 14 (0xe), region = 150 }
 0x48d   :  { %1689 = vsyncpa [#allocation4], 1 }
 0x48e   :  { %1691 = vsyncpa [#allocation4 + $0x1], 1 }
 0x48f   :  { %1692 = vsyncpa [#allocation7], 1 }
 0x490   :  { %1693 = vsyncpa [#allocation5], 1 }
 0x491   :  { %1695 = vsyncpa [#allocation5 + $0x1], 1 }

</bundles_post_ra>
